<compile_context>
chip_gen: v7x
topology: tpu7x:2x2x1
jax: 0.10.0
libtpu: 0.0.40
codegen_flags: <defaults>
</compile_context>

<pallas_src>
import numpy as np
import jax
import jax.numpy as jnp
from jax.experimental import pallas as pl
from jax.experimental.pallas import tpu as pltpu


def _temporal_encoder_kernel(omega_ref, phi_ref, ts_ref, out_ref):
    ts = ts_ref[...]                                   # (TB, S) f32, 0.0 = padding
    mask = ts != 0.0
    maskf = mask.astype(jnp.float32)

    # lengths / last valid timestamp (replicates gather(1, lengths - 1)).
    lengths = jnp.sum(mask.astype(jnp.int32), axis=1, keepdims=True)     # (TB, 1)
    pos = jax.lax.broadcasted_iota(jnp.int32, ts.shape, 1)               # (TB, S)
    last_ts = jnp.sum(jnp.where(pos == lengths - 1, ts, 0.0),
                      axis=1, keepdims=True)                             # (TB, 1)

    # Match the PyTorch reference: mask deltas BEFORE exp (no inf*0 NaN at pads).
    deltas = (last_ts - ts) * maskf                                      # (TB, S)
    w = jnp.exp(-deltas) * maskf                                         # (TB, S)
    denom = jnp.sum(w, axis=1, keepdims=True) + 1e-8                     # (TB, 1)
    inv = pl.reciprocal(denom, approx=False)                             # (TB, 1)

    num_features = out_ref.shape[1]
    cols = []
    for f in range(num_features):                     # F is a compile-time const
        wf = omega_ref[f]                             # scalars from SMEM
        pf = phi_ref[f]
        arg = ts * wf + pf                            # (TB, S)
        feat = arg if f == 0 else jnp.sin(arg)        # linear term for f == 0
        cols.append(jnp.sum(feat * w, axis=1, keepdims=True))   # (TB, 1)

    # Batched epilogue: one tanh over (TB, F) and a single store.
    acc = jnp.concatenate(cols, axis=1)               # (TB, F) un-normalized
    out_ref[...] = jnp.tanh(acc * inv)


def temporal_feature_encoder(padded_timestamps, omega, phi, *, block_b=256):
    """padded_timestamps: (B, S) f32 with 0.0 padding; omega, phi: (F,)."""
    ts = jnp.asarray(padded_timestamps, jnp.float32)
    B, S = ts.shape
    F = int(omega.shape[0])

    # Lane-align S (multiple of 128); batch tile TB (multiple of 8).
    S_pad = ((S + 127) // 128) * 128
    B8 = ((B + 7) // 8) * 8

    # ~3 MiB input-tile budget: with 2x input buffers plus the ~6 tile-sized
    # elementwise temporaries in the kernel, the resident footprint stays well
    # under the 32 MiB VMEM limit requested below (safe for v5e/v6e/v7x).
    max_rows = max(8, (3 * 1024 * 1024) // (S_pad * 4))
    TB = max(8, min(block_b, B8, (max_rows // 8) * 8))

    # v7x megacore: if the batch supports it, ensure >= 2 grid steps.
    if B8 >= 16 and (B8 + TB - 1) // TB < 2:
        TB = max(8, ((B8 // 2) // 8) * 8)

    grid_n = -(-B8 // TB)
    # Keep the grid even (2 TensorCores on v7x) when it is > 1.
    if grid_n > 1 and grid_n % 2 == 1:
        grid_n += 1
    B_pad = grid_n * TB

    ts_p = jnp.zeros((B_pad, S_pad), jnp.float32).at[:B, :S].set(ts)
    omega_f = jnp.asarray(omega, jnp.float32)
    phi_f = jnp.asarray(phi, jnp.float32)

    out = pl.pallas_call(
        _temporal_encoder_kernel,
        out_shape=jax.ShapeDtypeStruct((B_pad, F), jnp.float32),
        grid=(grid_n,),
        in_specs=[
            pl.BlockSpec(memory_space=pltpu.MemorySpace.SMEM),   # omega (F,)
            pl.BlockSpec(memory_space=pltpu.MemorySpace.SMEM),   # phi   (F,)
            pl.BlockSpec((TB, S_pad), lambda i: (i, 0)),         # timestamps
        ],
        out_specs=pl.BlockSpec((TB, F), lambda i: (i, 0)),
        compiler_params=pltpu.CompilerParams(
            dimension_semantics=("parallel",),
            vmem_limit_bytes=32 * 1024 * 1024),
    )(omega_f, phi_f, ts_p)
    return out[:B]


def pad_sequence_like_torch(timestamps_list, pad_value=0.0):
    """Glue: mimics torch.nn.utils.rnn.pad_sequence(batch_first=True)."""
    max_len = max(len(t) for t in timestamps_list)
    out = np.full((len(timestamps_list), max_len), pad_value, dtype=np.float32)
    for i, t in enumerate(timestamps_list):
        out[i, :len(t)] = np.asarray(t, dtype=np.float32)
    return jnp.asarray(out)


def _reference(padded_ts, omega, phi):
    """Pure-JAX reference mirroring the PyTorch forward (for self-check)."""
    mask = padded_ts != 0.0
    t = padded_ts[..., None]
    linear = omega[0] * t + phi[0]
    sins = jnp.sin(omega[1:] * t + phi[1:])
    feat = jnp.concatenate([linear, sins], axis=-1)
    lengths = mask.sum(axis=1)
    last = jnp.take_along_axis(padded_ts, (lengths - 1)[:, None], axis=1)[:, 0]
    deltas = (last[:, None] - padded_ts) * mask.astype(jnp.float32)
    w = jnp.exp(-deltas) * mask.astype(jnp.float32)
    w = w / (w.sum(axis=1, keepdims=True) + 1e-8)
    return jnp.tanh(jnp.sum(feat * w[..., None], axis=1))


if __name__ == "__main__":
    num_features = 16
    key = jax.random.PRNGKey(0)
    k_omega, k_phi, k_ts = jax.random.split(key, 3)

    # Parameters (deterministic stand-in for torch.randn init).
    omega = jax.random.normal(k_omega, (num_features,), dtype=jnp.float32)
    phi = jax.random.normal(k_phi, (num_features,), dtype=jnp.float32)

    # Variable-length timestamp lists (strictly positive so 0.0 == padding).
    # NOTE: timestamps exactly equal to 0.0 would be treated as padding, and
    # empty sequences are undefined in the PyTorch reference as well.
    lengths = [3, 5, 8, 2]
    raw = np.asarray(jax.random.uniform(k_ts, (len(lengths), 8),
                                        dtype=jnp.float32,
                                        minval=0.1, maxval=5.0))
    timestamps_list = [list(raw[i, :lengths[i]]) for i in range(len(lengths))]

    padded = pad_sequence_like_torch(timestamps_list)      # (4, 8)

    out = jax.block_until_ready(temporal_feature_encoder(padded, omega, phi))
    ref = jax.block_until_ready(_reference(padded, omega, phi))
    np.testing.assert_allclose(np.asarray(out), np.asarray(ref),
                               rtol=1e-5, atol=1e-5)

    print("KERNEL_OK")
</pallas_src>

<mosaic_0001>
module attributes {stable_mosaic.version = 11 : i64} {
  func.func @_temporal_encoder_kernel(%arg0: i32, %arg1: memref<16xf32, #tpu.memory_space<smem>>, %arg2: memref<16xf32, #tpu.memory_space<smem>>, %arg3: memref<8x128xf32, #tpu.memory_space<vmem>>, %arg4: memref<8x16xf32, #tpu.memory_space<vmem>>) attributes {dimension_semantics = [#tpu.dimension_semantics<parallel>], iteration_bounds = array<i64: 1>, scalar_prefetch = 0 : i64, scratch_operands = 0 : i64, tpu.core_type = #tpu.core_type<tc>, window_params = [{transform_indices = @transform_0, window_bounds = array<i64: 16>}, {transform_indices = @transform_1, window_bounds = array<i64: 16>}, {transform_indices = @transform_2, window_bounds = array<i64: 8, 128>}, {transform_indices = @transform_3, window_bounds = array<i64: 8, 16>}]} {
    %c0 = arith.constant 0 : index
    %c0_0 = arith.constant 0 : index
    %0 = vector.load %arg3[%c0, %c0_0] : memref<8x128xf32, #tpu.memory_space<vmem>>, vector<8x128xf32>
    %cst = arith.constant 0.000000e+00 : f32
    %1 = vector.broadcast %cst : f32 to vector<8x128xf32>
    %2 = arith.cmpf one, %0, %1 : vector<8x128xf32>
    %3 = arith.extui %2 : vector<8x128xi1> to vector<8x128xi32>
    %4 = arith.sitofp %3 : vector<8x128xi32> to vector<8x128xf32>
    %5 = arith.extui %2 : vector<8x128xi1> to vector<8x128xi32>
    %cst_1 = arith.constant dense<0> : vector<8xi32>
    %6 = vector.multi_reduction <add>, %5, %cst_1 [1] : vector<8x128xi32> to vector<8xi32>
    %7 = vector.shape_cast %6 : vector<8xi32> to vector<8x1xi32>
    %8 = tpu.iota {dimensions = array<i32: 1>} : vector<8x128xi32>
    %c1_i32 = arith.constant 1 : i32
    %9 = vector.broadcast %c1_i32 : i32 to vector<8x1xi32>
    %10 = arith.subi %7, %9 : vector<8x1xi32>
    %11 = vector.broadcast %10 : vector<8x1xi32> to vector<8x128xi32>
    %12 = arith.cmpi eq, %8, %11 : vector<8x128xi32>
    %cst_2 = arith.constant 0.000000e+00 : f32
    %13 = vector.broadcast %cst_2 : f32 to vector<8x128xf32>
    %14 = arith.select %12, %0, %13 : vector<8x128xi1>, vector<8x128xf32>
    %cst_3 = arith.constant dense<0.000000e+00> : vector<8xf32>
    %15 = vector.multi_reduction <add>, %14, %cst_3 [1] : vector<8x128xf32> to vector<8xf32>
    %16 = vector.shape_cast %15 : vector<8xf32> to vector<8x1xf32>
    %17 = vector.broadcast %16 : vector<8x1xf32> to vector<8x128xf32>
    %18 = arith.subf %17, %0 : vector<8x128xf32>
    %19 = arith.mulf %18, %4 : vector<8x128xf32>
    %cst_4 = arith.constant 0.000000e+00 : f32
    %20 = vector.broadcast %cst_4 : f32 to vector<8x128xf32>
    %21 = arith.subf %20, %19 : vector<8x128xf32>
    %22 = math.exp %21 : vector<8x128xf32>
    %23 = arith.mulf %22, %4 : vector<8x128xf32>
    %cst_5 = arith.constant dense<0.000000e+00> : vector<8xf32>
    %24 = vector.multi_reduction <add>, %23, %cst_5 [1] : vector<8x128xf32> to vector<8xf32>
    %25 = vector.shape_cast %24 : vector<8xf32> to vector<8x1xf32>
    %cst_6 = arith.constant 9.99999993E-9 : f32
    %26 = vector.broadcast %cst_6 : f32 to vector<8x1xf32>
    %27 = arith.addf %25, %26 : vector<8x1xf32>
    %28 = tpu.reciprocal %27 : vector<8x1xf32> -> vector<8x1xf32>
    %c0_7 = arith.constant 0 : index
    %29 = memref.load %arg1[%c0_7] : memref<16xf32, #tpu.memory_space<smem>>
    %c0_8 = arith.constant 0 : index
    %30 = memref.load %arg2[%c0_8] : memref<16xf32, #tpu.memory_space<smem>>
    %31 = vector.broadcast %29 : f32 to vector<8x128xf32>
    %32 = arith.mulf %0, %31 : vector<8x128xf32>
    %33 = vector.broadcast %30 : f32 to vector<8x128xf32>
    %34 = arith.addf %32, %33 : vector<8x128xf32>
    %35 = arith.mulf %34, %23 : vector<8x128xf32>
    %cst_9 = arith.constant dense<0.000000e+00> : vector<8xf32>
    %36 = vector.multi_reduction <add>, %35, %cst_9 [1] : vector<8x128xf32> to vector<8xf32>
    %37 = vector.shape_cast %36 : vector<8xf32> to vector<8x1xf32>
    %c1 = arith.constant 1 : index
    %38 = memref.load %arg1[%c1] : memref<16xf32, #tpu.memory_space<smem>>
    %c1_10 = arith.constant 1 : index
    %39 = memref.load %arg2[%c1_10] : memref<16xf32, #tpu.memory_space<smem>>
    %40 = vector.broadcast %38 : f32 to vector<8x128xf32>
    %41 = arith.mulf %0, %40 : vector<8x128xf32>
    %42 = vector.broadcast %39 : f32 to vector<8x128xf32>
    %43 = arith.addf %41, %42 : vector<8x128xf32>
    %44 = math.sin %43 : vector<8x128xf32>
    %45 = arith.mulf %44, %23 : vector<8x128xf32>
    %cst_11 = arith.constant dense<0.000000e+00> : vector<8xf32>
    %46 = vector.multi_reduction <add>, %45, %cst_11 [1] : vector<8x128xf32> to vector<8xf32>
    %47 = vector.shape_cast %46 : vector<8xf32> to vector<8x1xf32>
    %c2 = arith.constant 2 : index
    %48 = memref.load %arg1[%c2] : memref<16xf32, #tpu.memory_space<smem>>
    %c2_12 = arith.constant 2 : index
    %49 = memref.load %arg2[%c2_12] : memref<16xf32, #tpu.memory_space<smem>>
    %50 = vector.broadcast %48 : f32 to vector<8x128xf32>
    %51 = arith.mulf %0, %50 : vector<8x128xf32>
    %52 = vector.broadcast %49 : f32 to vector<8x128xf32>
    %53 = arith.addf %51, %52 : vector<8x128xf32>
    %54 = math.sin %53 : vector<8x128xf32>
    %55 = arith.mulf %54, %23 : vector<8x128xf32>
    %cst_13 = arith.constant dense<0.000000e+00> : vector<8xf32>
    %56 = vector.multi_reduction <add>, %55, %cst_13 [1] : vector<8x128xf32> to vector<8xf32>
    %57 = vector.shape_cast %56 : vector<8xf32> to vector<8x1xf32>
    %c3 = arith.constant 3 : index
    %58 = memref.load %arg1[%c3] : memref<16xf32, #tpu.memory_space<smem>>
    %c3_14 = arith.constant 3 : index
    %59 = memref.load %arg2[%c3_14] : memref<16xf32, #tpu.memory_space<smem>>
    %60 = vector.broadcast %58 : f32 to vector<8x128xf32>
    %61 = arith.mulf %0, %60 : vector<8x128xf32>
    %62 = vector.broadcast %59 : f32 to vector<8x128xf32>
    %63 = arith.addf %61, %62 : vector<8x128xf32>
    %64 = math.sin %63 : vector<8x128xf32>
    %65 = arith.mulf %64, %23 : vector<8x128xf32>
    %cst_15 = arith.constant dense<0.000000e+00> : vector<8xf32>
    %66 = vector.multi_reduction <add>, %65, %cst_15 [1] : vector<8x128xf32> to vector<8xf32>
    %67 = vector.shape_cast %66 : vector<8xf32> to vector<8x1xf32>
    %c4 = arith.constant 4 : index
    %68 = memref.load %arg1[%c4] : memref<16xf32, #tpu.memory_space<smem>>
    %c4_16 = arith.constant 4 : index
    %69 = memref.load %arg2[%c4_16] : memref<16xf32, #tpu.memory_space<smem>>
    %70 = vector.broadcast %68 : f32 to vector<8x128xf32>
    %71 = arith.mulf %0, %70 : vector<8x128xf32>
    %72 = vector.broadcast %69 : f32 to vector<8x128xf32>
    %73 = arith.addf %71, %72 : vector<8x128xf32>
    %74 = math.sin %73 : vector<8x128xf32>
    %75 = arith.mulf %74, %23 : vector<8x128xf32>
    %cst_17 = arith.constant dense<0.000000e+00> : vector<8xf32>
    %76 = vector.multi_reduction <add>, %75, %cst_17 [1] : vector<8x128xf32> to vector<8xf32>
    %77 = vector.shape_cast %76 : vector<8xf32> to vector<8x1xf32>
    %c5 = arith.constant 5 : index
    %78 = memref.load %arg1[%c5] : memref<16xf32, #tpu.memory_space<smem>>
    %c5_18 = arith.constant 5 : index
    %79 = memref.load %arg2[%c5_18] : memref<16xf32, #tpu.memory_space<smem>>
    %80 = vector.broadcast %78 : f32 to vector<8x128xf32>
    %81 = arith.mulf %0, %80 : vector<8x128xf32>
    %82 = vector.broadcast %79 : f32 to vector<8x128xf32>
    %83 = arith.addf %81, %82 : vector<8x128xf32>
    %84 = math.sin %83 : vector<8x128xf32>
    %85 = arith.mulf %84, %23 : vector<8x128xf32>
    %cst_19 = arith.constant dense<0.000000e+00> : vector<8xf32>
    %86 = vector.multi_reduction <add>, %85, %cst_19 [1] : vector<8x128xf32> to vector<8xf32>
    %87 = vector.shape_cast %86 : vector<8xf32> to vector<8x1xf32>
    %c6 = arith.constant 6 : index
    %88 = memref.load %arg1[%c6] : memref<16xf32, #tpu.memory_space<smem>>
    %c6_20 = arith.constant 6 : index
    %89 = memref.load %arg2[%c6_20] : memref<16xf32, #tpu.memory_space<smem>>
    %90 = vector.broadcast %88 : f32 to vector<8x128xf32>
    %91 = arith.mulf %0, %90 : vector<8x128xf32>
    %92 = vector.broadcast %89 : f32 to vector<8x128xf32>
    %93 = arith.addf %91, %92 : vector<8x128xf32>
    %94 = math.sin %93 : vector<8x128xf32>
    %95 = arith.mulf %94, %23 : vector<8x128xf32>
    %cst_21 = arith.constant dense<0.000000e+00> : vector<8xf32>
    %96 = vector.multi_reduction <add>, %95, %cst_21 [1] : vector<8x128xf32> to vector<8xf32>
    %97 = vector.shape_cast %96 : vector<8xf32> to vector<8x1xf32>
    %c7 = arith.constant 7 : index
    %98 = memref.load %arg1[%c7] : memref<16xf32, #tpu.memory_space<smem>>
    %c7_22 = arith.constant 7 : index
    %99 = memref.load %arg2[%c7_22] : memref<16xf32, #tpu.memory_space<smem>>
    %100 = vector.broadcast %98 : f32 to vector<8x128xf32>
    %101 = arith.mulf %0, %100 : vector<8x128xf32>
    %102 = vector.broadcast %99 : f32 to vector<8x128xf32>
    %103 = arith.addf %101, %102 : vector<8x128xf32>
    %104 = math.sin %103 : vector<8x128xf32>
    %105 = arith.mulf %104, %23 : vector<8x128xf32>
    %cst_23 = arith.constant dense<0.000000e+00> : vector<8xf32>
    %106 = vector.multi_reduction <add>, %105, %cst_23 [1] : vector<8x128xf32> to vector<8xf32>
    %107 = vector.shape_cast %106 : vector<8xf32> to vector<8x1xf32>
    %c8 = arith.constant 8 : index
    %108 = memref.load %arg1[%c8] : memref<16xf32, #tpu.memory_space<smem>>
    %c8_24 = arith.constant 8 : index
    %109 = memref.load %arg2[%c8_24] : memref<16xf32, #tpu.memory_space<smem>>
    %110 = vector.broadcast %108 : f32 to vector<8x128xf32>
    %111 = arith.mulf %0, %110 : vector<8x128xf32>
    %112 = vector.broadcast %109 : f32 to vector<8x128xf32>
    %113 = arith.addf %111, %112 : vector<8x128xf32>
    %114 = math.sin %113 : vector<8x128xf32>
    %115 = arith.mulf %114, %23 : vector<8x128xf32>
    %cst_25 = arith.constant dense<0.000000e+00> : vector<8xf32>
    %116 = vector.multi_reduction <add>, %115, %cst_25 [1] : vector<8x128xf32> to vector<8xf32>
    %117 = vector.shape_cast %116 : vector<8xf32> to vector<8x1xf32>
    %c9 = arith.constant 9 : index
    %118 = memref.load %arg1[%c9] : memref<16xf32, #tpu.memory_space<smem>>
    %c9_26 = arith.constant 9 : index
    %119 = memref.load %arg2[%c9_26] : memref<16xf32, #tpu.memory_space<smem>>
    %120 = vector.broadcast %118 : f32 to vector<8x128xf32>
    %121 = arith.mulf %0, %120 : vector<8x128xf32>
    %122 = vector.broadcast %119 : f32 to vector<8x128xf32>
    %123 = arith.addf %121, %122 : vector<8x128xf32>
    %124 = math.sin %123 : vector<8x128xf32>
    %125 = arith.mulf %124, %23 : vector<8x128xf32>
    %cst_27 = arith.constant dense<0.000000e+00> : vector<8xf32>
    %126 = vector.multi_reduction <add>, %125, %cst_27 [1] : vector<8x128xf32> to vector<8xf32>
    %127 = vector.shape_cast %126 : vector<8xf32> to vector<8x1xf32>
    %c10 = arith.constant 10 : index
    %128 = memref.load %arg1[%c10] : memref<16xf32, #tpu.memory_space<smem>>
    %c10_28 = arith.constant 10 : index
    %129 = memref.load %arg2[%c10_28] : memref<16xf32, #tpu.memory_space<smem>>
    %130 = vector.broadcast %128 : f32 to vector<8x128xf32>
    %131 = arith.mulf %0, %130 : vector<8x128xf32>
    %132 = vector.broadcast %129 : f32 to vector<8x128xf32>
    %133 = arith.addf %131, %132 : vector<8x128xf32>
    %134 = math.sin %133 : vector<8x128xf32>
    %135 = arith.mulf %134, %23 : vector<8x128xf32>
    %cst_29 = arith.constant dense<0.000000e+00> : vector<8xf32>
    %136 = vector.multi_reduction <add>, %135, %cst_29 [1] : vector<8x128xf32> to vector<8xf32>
    %137 = vector.shape_cast %136 : vector<8xf32> to vector<8x1xf32>
    %c11 = arith.constant 11 : index
    %138 = memref.load %arg1[%c11] : memref<16xf32, #tpu.memory_space<smem>>
    %c11_30 = arith.constant 11 : index
    %139 = memref.load %arg2[%c11_30] : memref<16xf32, #tpu.memory_space<smem>>
    %140 = vector.broadcast %138 : f32 to vector<8x128xf32>
    %141 = arith.mulf %0, %140 : vector<8x128xf32>
    %142 = vector.broadcast %139 : f32 to vector<8x128xf32>
    %143 = arith.addf %141, %142 : vector<8x128xf32>
    %144 = math.sin %143 : vector<8x128xf32>
    %145 = arith.mulf %144, %23 : vector<8x128xf32>
    %cst_31 = arith.constant dense<0.000000e+00> : vector<8xf32>
    %146 = vector.multi_reduction <add>, %145, %cst_31 [1] : vector<8x128xf32> to vector<8xf32>
    %147 = vector.shape_cast %146 : vector<8xf32> to vector<8x1xf32>
    %c12 = arith.constant 12 : index
    %148 = memref.load %arg1[%c12] : memref<16xf32, #tpu.memory_space<smem>>
    %c12_32 = arith.constant 12 : index
    %149 = memref.load %arg2[%c12_32] : memref<16xf32, #tpu.memory_space<smem>>
    %150 = vector.broadcast %148 : f32 to vector<8x128xf32>
    %151 = arith.mulf %0, %150 : vector<8x128xf32>
    %152 = vector.broadcast %149 : f32 to vector<8x128xf32>
    %153 = arith.addf %151, %152 : vector<8x128xf32>
    %154 = math.sin %153 : vector<8x128xf32>
    %155 = arith.mulf %154, %23 : vector<8x128xf32>
    %cst_33 = arith.constant dense<0.000000e+00> : vector<8xf32>
    %156 = vector.multi_reduction <add>, %155, %cst_33 [1] : vector<8x128xf32> to vector<8xf32>
    %157 = vector.shape_cast %156 : vector<8xf32> to vector<8x1xf32>
    %c13 = arith.constant 13 : index
    %158 = memref.load %arg1[%c13] : memref<16xf32, #tpu.memory_space<smem>>
    %c13_34 = arith.constant 13 : index
    %159 = memref.load %arg2[%c13_34] : memref<16xf32, #tpu.memory_space<smem>>
    %160 = vector.broadcast %158 : f32 to vector<8x128xf32>
    %161 = arith.mulf %0, %160 : vector<8x128xf32>
    %162 = vector.broadcast %159 : f32 to vector<8x128xf32>
    %163 = arith.addf %161, %162 : vector<8x128xf32>
    %164 = math.sin %163 : vector<8x128xf32>
    %165 = arith.mulf %164, %23 : vector<8x128xf32>
    %cst_35 = arith.constant dense<0.000000e+00> : vector<8xf32>
    %166 = vector.multi_reduction <add>, %165, %cst_35 [1] : vector<8x128xf32> to vector<8xf32>
    %167 = vector.shape_cast %166 : vector<8xf32> to vector<8x1xf32>
    %c14 = arith.constant 14 : index
    %168 = memref.load %arg1[%c14] : memref<16xf32, #tpu.memory_space<smem>>
    %c14_36 = arith.constant 14 : index
    %169 = memref.load %arg2[%c14_36] : memref<16xf32, #tpu.memory_space<smem>>
    %170 = vector.broadcast %168 : f32 to vector<8x128xf32>
    %171 = arith.mulf %0, %170 : vector<8x128xf32>
    %172 = vector.broadcast %169 : f32 to vector<8x128xf32>
    %173 = arith.addf %171, %172 : vector<8x128xf32>
    %174 = math.sin %173 : vector<8x128xf32>
    %175 = arith.mulf %174, %23 : vector<8x128xf32>
    %cst_37 = arith.constant dense<0.000000e+00> : vector<8xf32>
    %176 = vector.multi_reduction <add>, %175, %cst_37 [1] : vector<8x128xf32> to vector<8xf32>
    %177 = vector.shape_cast %176 : vector<8xf32> to vector<8x1xf32>
    %c15 = arith.constant 15 : index
    %178 = memref.load %arg1[%c15] : memref<16xf32, #tpu.memory_space<smem>>
    %c15_38 = arith.constant 15 : index
    %179 = memref.load %arg2[%c15_38] : memref<16xf32, #tpu.memory_space<smem>>
    %180 = vector.broadcast %178 : f32 to vector<8x128xf32>
    %181 = arith.mulf %0, %180 : vector<8x128xf32>
    %182 = vector.broadcast %179 : f32 to vector<8x128xf32>
    %183 = arith.addf %181, %182 : vector<8x128xf32>
    %184 = math.sin %183 : vector<8x128xf32>
    %185 = arith.mulf %184, %23 : vector<8x128xf32>
    %cst_39 = arith.constant dense<0.000000e+00> : vector<8xf32>
    %186 = vector.multi_reduction <add>, %185, %cst_39 [1] : vector<8x128xf32> to vector<8xf32>
    %187 = vector.shape_cast %186 : vector<8xf32> to vector<8x1xf32>
    %188 = tpu.concatenate %37, %47, %57, %67, %77, %87, %97, %107, %117, %127, %137, %147, %157, %167, %177, %187 in 1 : vector<8x1xf32>, vector<8x1xf32>, vector<8x1xf32>, vector<8x1xf32>, vector<8x1xf32>, vector<8x1xf32>, vector<8x1xf32>, vector<8x1xf32>, vector<8x1xf32>, vector<8x1xf32>, vector<8x1xf32>, vector<8x1xf32>, vector<8x1xf32>, vector<8x1xf32>, vector<8x1xf32>, vector<8x1xf32> -> vector<8x16xf32>
    %189 = vector.broadcast %28 : vector<8x1xf32> to vector<8x16xf32>
    %190 = arith.mulf %188, %189 : vector<8x16xf32>
    %191 = math.tanh %190 : vector<8x16xf32>
    %c0_40 = arith.constant 0 : index
    %c0_41 = arith.constant 0 : index
    %192 = vector.load %arg4[%c0_40, %c0_41] : memref<8x16xf32, #tpu.memory_space<vmem>>, vector<8x16xf32>
    tpu.vector_store %arg4[%c0_40, %c0_41], %191 {strides = array<i32>} : memref<8x16xf32, #tpu.memory_space<vmem>>, vector<8x16xf32>,
    return
  }
  func.func @transform_0(%arg0: i32) -> i32 {
    %c0_i32 = arith.constant 0 : i32
    %c0_i32_0 = arith.constant 0 : i32
    return %c0_i32 : i32
  }
  func.func @transform_1(%arg0: i32) -> i32 {
    %c0_i32 = arith.constant 0 : i32
    %c0_i32_0 = arith.constant 0 : i32
    return %c0_i32 : i32
  }
  func.func @transform_2(%arg0: i32) -> (i32, i32) {
    %c0_i32 = arith.constant 0 : i32
    %c0_i32_0 = arith.constant 0 : i32
    return %arg0, %c0_i32 : i32, i32
  }
  func.func @transform_3(%arg0: i32) -> (i32, i32) {
    %c0_i32 = arith.constant 0 : i32
    %c0_i32_0 = arith.constant 0 : i32
    return %arg0, %c0_i32 : i32, i32
  }
}

</mosaic_0001>

<bundles_post_ra>
// kernel: tpu_custom_call.1
= control target key start
LH: loop header
LB: loop body
LE: loop exit
PB: predicated region body
PF: predicated region fallthrough
CT: control target
= control target key end

     0   :  { %8 = vsyncpa [#allocation5], 0  ;;  %s3628_s0 = inlined_call_operand.hbm [shape: f32[16], index: 0, kind: input, shape index: {}]   ;;  %s3629_s1 = inlined_call_operand.vmem [shape: f32[16], index: 1, kind: input, shape index: {}]   ;;  %s3630_s2 = inlined_call_operand.hbm [shape: f32[8,128], index: 2, kind: input, shape index: {}]   ;;  %s3631_s3 = inlined_call_operand.hbm [shape: f32[8,16], index: 3, kind: output, shape index: {}]  }
   0x1   :  { %9 = vsyncpa [#allocation6], 0 }
   0x2   :  { %10 = vsyncpa [#allocation3], 0 }
   0x3   :  { %11 = vsyncpa [#allocation4], 0  ;;  %s26_s14 = sshll.u32 %s3629_s1, 4  ;;  %s2070_s17 = scalar_lea.hbm %s3628_s0, 16  ;;  %s27_s14 = int_to_ptr.vmem [resolvable:$true] %s26_s14 }
   0x4   :  { %p2071_p0 = scmp.ne.s32.totalorder %s3628_s0, %s2070_s17  ;;  %p2074_p1 = scmp.lt.u32.totalorder %s2070_s17, %s3628_s0 }
   0x6   :  { %p2076_p2 = pnand %p2074_p1, %p2071_p0 }
   0x8   :  { %2079 = shalt.err (!%p2076_p2)
}
   0x9   :  { %s2144_s22 = smov [#allocation2]   ;;  %s2080_s1 = scalar_lea.vmem %s27_s14, 16 }
   0xa   :  { %19 = dma.hbm_to_smem %s3628_s0, 16, %s2144_s22, [#allocation5]  }
   0xb   :  { %p2081_p3 = scmp.ne.s32.totalorder %s27_s14, %s2080_s1  ;;  %p2085_p4 = scmp.lt.s32.totalorder %s27_s14, %s27_s14 }
   0xc   :  { %p2086_p5 = scmp.lt.s32.totalorder %s2080_s1, %s2080_s1 }
   0xe   :  { %p2087_p6 = por %p2086_p5, %p2085_p4 }
  0x10   :  { %p2088_p7 = pnand %p2087_p6, %p2081_p3 }
  0x12   :  { %2091 = shalt.err (!%p2088_p7)
}
  0x13   :  { %s2145_s25 = smov [#allocation7]   ;;  %s2146_s26 = smov [#allocation8]  }
  0x14   :  { %29 = dma.vmem_to_smem %s27_s14, 16, %s2145_s25, [#allocation6]  }
  0x15   :  { %s36_s27 = sshll.u32 %s2146_s26, 4  ;;  %s2092_s30 = scalar_lea.hbm %s3630_s2, 128  ;;  %s37_s27 = int_to_ptr.vmem [resolvable:$true] %s36_s27 }
  0x16   :  { %p2093_p8 = scmp.ne.s32.totalorder %s3630_s2, %s2092_s30  ;;  %p2096_p9 = scmp.lt.u32.totalorder %s2092_s30, %s3630_s2 }
  0x18   :  { %p2098_p10 = pnand %p2096_p9, %p2093_p8 }
  0x1a   :  { %2101 = shalt.err (!%p2098_p10)
}
  0x1b   :  { %s2102_s7 = scalar_lea.vmem %s37_s27, 128  ;;  %p2107_p12 = scmp.lt.s32.totalorder %s37_s27, %s37_s27 }
  0x1c   :  { %p2103_p11 = scmp.ne.s32.totalorder %s37_s27, %s2102_s7  ;;  %p2108_p13 = scmp.lt.s32.totalorder %s2102_s7, %s2102_s7 }
  0x1e   :  { %p2109_p0 = por %p2108_p13, %p2107_p12 }
  0x20   :  { %p2110_p1 = pnand %p2109_p0, %p2103_p11 }
  0x22   :  { %2113 = shalt.err (!%p2110_p1)
}
  0x23   :  { %39 = dma.hbm_to_vmem [thread:$0]  %s3630_s2, 128, %s37_s27, [#allocation3]  }
  0x24   :  { %2136 = dma.done.wait [#allocation5], 16  }
  0x25   :  { %2137 = vsyncadd [#allocation5], 4294967280 }
  0x26   :  { %2138 = dma.done.wait [#allocation6], 16  }
  0x27   :  { %2139 = vsyncadd [#allocation6], 4294967280 }
  0x28   :  { %2140 = dma.done.wait [#allocation3], 128  }
  0x29   :  { %2141 = vsyncadd [#allocation3], 4294967168 }
  0x2a   :  { %49 = sfence }
  0x2b   :  { %v2203_v0 = vld [vmem:[#allocation8] sm:$0xff]  ;;  %v2147_v1 = vmov 0   ;;  %s1840_s2 = sld [smem:[#allocation2 + $0x1]]  ;;  %s1846_s10 = sld [smem:[#allocation2 + $0x2]]  ;;  %v66_v31 = vlaneseq  ;;  %v2148_v49 = vmov 2102212464  }
  0x2c   :  { %vm51_vm0 = vcmp.ne.f32.partialorder %v2203_v0, 0.0  ;;  %s1858_s11 = sld [smem:[#allocation2 + $0x4]]  ;;  %s1841_s12 = sld [smem:[#allocation7 + $0x1]]  ;;  %v2149_v53 = vmov 683565275  }
  0x2d   :  { %v52_v2 = vsel %vm51_vm0, 1, %v2147_v1  ;;  %s1847_s13 = sld [smem:[#allocation7 + $0x2]]  ;;  %s1859_s14 = sld [smem:[#allocation7 + $0x4]]  ;;  %v2227_v40 = vand.u32 127, %v66_v31  ;;  %v2150_v55 = vmov 2475754826  }
  0x2e   :  { %v55_v3 = vshrl.u32 %v52_v2, 16  ;;  %v54_v4 = vand.u32 65535, %v52_v2  ;;  %s1852_s15 = sld [smem:[#allocation2 + $0x3]]  ;;  %s1870_s17 = sld [smem:[#allocation2 + $0x6]]  ;;  %v2151_v58 = vmov 2131351028  }
  0x2f   :  { %s1853_s16 = sld [smem:[#allocation7 + $0x3]]  ;;  %s2220_s18 = sld [smem:[#allocation7 + $0x6]]  ;;  %v2152_v1 = vmov 920167782  }
  0x30   :  { %v57_v5 = vcvt.s32.f32 %v55_v3  ;;  %v56_v6 = vcvt.s32.f32 %v54_v4  ;;  %s2222_s19 = sld [smem:[#allocation2 + $0x5]]  ;;  %s2370_s21 = sld [smem:[#allocation2 + $0x8]] }
  0x31   :  { %v94_v7 = vstv %s1840_s2  ;;  %v207_v8 = vstv %s1846_s10  ;;  %s2361_s20 = sld [smem:[#allocation7 + $0x5]]  ;;  %s2388_s22 = sld [smem:[#allocation7 + $0x8]] }
  0x32   :  { %60 = vadd.xlane.f32.xlu0 %v57_v5  ;;  %v95_v9 = vmul.f32 %v94_v7, %v2203_v0  ;;  %v208_v10 = vmul.f32 %v207_v8, %v2203_v0  ;;  %v433_v11 = vstv %s1858_s11  ;;  %v96_v12 = vstv %s1841_s12  ;;  %s2437_s23 = sld [smem:[#allocation2 + $0x7]]  ;;  %s2527_s24 = sld [smem:[#allocation2]] }
  0x33   :  { %v209_v13 = vstv %s1847_s13  ;;  %v434_v14 = vmul.f32 %v433_v11, %v2203_v0  ;;  %v435_v17 = vstv %s1859_s14  ;;  %v2153_v7 = vmov 1326507024   ;;  %s2576_s1 = sld [smem:[#allocation7]]  ;;  %s2731_s25 = sld [smem:[#allocation7 + $0x7]] }
  0x34   :  { %v2211_v15 = vadd.f32 %v96_v12, %v95_v9  ;;  %v2213_v16 = vadd.f32 %v209_v13, %v208_v10  ;;  %v320_v27 = vstv %s1852_s15  ;;  %v659_v37 = vstv %s1870_s17  ;;  %s2741_s26 = sld [smem:[#allocation2 + $0xa]]  ;;  %s3021_s28 = sld [smem:[#allocation2 + $0x9]] }
  0x35   :  { %v2215_v18 = vadd.f32 %v435_v17, %v434_v14  ;;  %v321_v33 = vmul.f32 %v320_v27, %v2203_v0  ;;  %v322_v34 = vstv %s1853_s16  ;;  %v661_v42 = vstv %s2220_s18  ;;  %s2831_s27 = sld [smem:[#allocation7 + $0xa]]  ;;  %s3023_s29 = sld [smem:[#allocation7 + $0x9]] }
  0x36   :  { %58 = vadd.xlane.f32.xlu0 %v56_v6  ;;  %v101_v19 = vand.u32 2139095040, %v2211_v15  ;;  %v214_v20 = vand.u32 2139095040, %v2213_v16  ;;  %v2238_v46 = vmul.f32 %v659_v37, %v2203_v0  ;;  %v98_v47 = vand.u32 2147483647, %v2211_v15  ;;  %s3128_s30 = sld [smem:[#allocation2 + $0xc]]  ;;  %s3191_s5 = sld [smem:[#allocation2 + $0xb]] }
  0x37   :  { %v440_v21 = vand.u32 2139095040, %v2215_v18  ;;  %v2229_v41 = vadd.f32 %v322_v34, %v321_v33  ;;  %v546_v48 = vstv %s2222_s19  ;;  %v211_v14 = vand.u32 2147483647, %v2213_v16  ;;  %s3134_s4 = sld [smem:[#allocation7 + $0xc]]  ;;  %s3209_s0 = sld [smem:[#allocation7 + $0xb]] }
  0x38   :  { %v102_v22 = vshrl.u32 %v101_v19, 23  ;;  %v215_v23 = vshrl.u32 %v214_v20, 23  ;;  %v105_v51 = vand.u32 8388607, %v98_v47  ;;  %s3307_s6 = sld [smem:[#allocation2 + $0xe]]  ;;  %s3379_s8 = sld [smem:[#allocation2 + $0xd]] }
  0x39   :  { %v441_v24 = vshrl.u32 %v440_v21, 23  ;;  %s3309_s7 = sld [smem:[#allocation7 + $0xe]]  ;;  %s3393_s9 = sld [smem:[#allocation7 + $0xd]] }
  0x3a   :  { %v1842_v25 = vadd.s32 4294967169, %v102_v22  ;;  %v1848_v26 = vadd.s32 4294967169, %v215_v23  ;;  %v106_v62 = vor.u32 8388608, %v105_v51  ;;  %s3461_s2 = sld [smem:[#allocation2 + $0xf]]  ;;  %s2155_s11 = smov [#allocation9]  }
  0x3b   :  { %v1860_v28 = vadd.s32 4294967169, %v441_v24  ;;  %s3474_s10 = sld [smem:[#allocation7 + $0xf]]  ;;  %s1827_s12 = sshll.u32 %s2155_s11, 4  ;;  %s1828_s12 = int_to_ptr.vmem [resolvable:$true] %s1827_s12 }
  0x3c   :  { %v108_v29 = vadd.s32 1, %v1842_v25  ;;  %v221_v30 = vadd.s32 1, %v1848_v26  ;;  %v146_v11 = vshll.u32 %v106_v62, 8  ;;  %v218_v26 = vand.u32 8388607, %v211_v14  ;;  %s2114_s13 = scalar_lea.vmem %s1828_s12, 128  ;;  %p2119_p3 = scmp.lt.s32.totalorder %s1828_s12, %s1828_s12 }
  0x3d   :  { %v447_v32 = vadd.s32 1, %v1860_v28  ;;  %p2115_p2 = scmp.ne.s32.totalorder %s1828_s12, %s2114_s13  ;;  %p2120_p4 = scmp.lt.s32.totalorder %s2114_s13, %s2114_s13 }
  0x3e   :  { %vm109_vm1 = vcmp.gt.s32.totalorder %v108_v29, 0  ;;  %vm222_vm2 = vcmp.gt.s32.totalorder %v221_v30, 0 }
  0x3f   :  { %v110_v35 = vsel %vm109_vm1, %v108_v29, 0  ;;  %v223_v36 = vsel %vm222_vm2, %v221_v30, 0  ;;  %vm448_vm3 = vcmp.gt.s32.totalorder %v447_v32, 0  ;;  %p2121_p5 = por %p2120_p4, %p2119_p3 }
  0x40   :  { %v112_v38 = vand.u32 31, %v110_v35  ;;  %v2225_v39 = vand.u32 31, %v223_v36  ;;  %v2235_v45 = vsel %vm448_vm3, %v447_v32, 0  ;;  %v111_v52 = vshrl.u32 %v110_v35, 5 }
  0x41   :  { %v2257_v17 = vshrl.u32 %v223_v36, 5  ;;  %p2122_p6 = pnand %p2121_p5, %p2115_p2 }
  0x42   :  { %v113_v43 = vsub.s32 32, %v112_v38  ;;  %v2233_v44 = vsub.s32 32, %v2225_v39  ;;  %v124_v50 = vshll.u32 %v2148_v49, %v112_v38  ;;  %v115_v54 = vshll.u32 %v2149_v53, %v112_v38 }
  0x43   :  { %v118_v57 = vshll.u32 %v2150_v55, %v112_v38  ;;  %v121_v60 = vshll.u32 %v2151_v58, %v112_v38  ;;  %v127_v3 = vshll.u32 %v2152_v1, %v112_v38  ;;  %vm130_vm4 = vcmp.lt.s32.totalorder %v111_v52, 1 }
  0x44   :  { %v116_v56 = vshrl.u32 %v2150_v55, %v113_v43  ;;  %v119_v59 = vshrl.u32 %v2151_v58, %v113_v43  ;;  %v122_v61 = vshrl.u32 %v2148_v49, %v113_v43  ;;  %v125_v2 = vshrl.u32 %v2152_v1, %v113_v43 }
  0x45   :  { %v128_v8 = vshrl.u32 %v2153_v7, %v113_v43  ;;  %vm131_vm5 = vcmp.lt.s32.totalorder %v111_v52, 2  ;;  %vm132_vm6 = vcmp.lt.s32.totalorder %v111_v52, 3  ;;  %vm133_vm7 = vcmp.lt.s32.totalorder %v111_v52, 4 }
  0x46   :  { %v117_v63 = vor.u32 %v116_v56, %v115_v54  ;;  %v120_v4 = vor.u32 %v119_v59, %v118_v57  ;;  %v123_v5 = vor.u32 %v122_v61, %v121_v60  ;;  %v126_v6 = vor.u32 %v125_v2, %v124_v50 }
  0x47   :  { %v129_v12 = vor.u32 %v128_v8, %v127_v3  ;;  %v114_v19 = vshrl.u32 %v2149_v53, %v113_v43  ;;  %v227_v21 = vshrl.u32 %v2149_v53, %v2233_v44  ;;  %v228_v22 = vshll.u32 %v2149_v53, %v2225_v39 }
  0x48   :  { %v138_v9 = vsel %vm130_vm4, %v117_v63, %v120_v4  ;;  %v142_v10 = vsel %vm130_vm4, %v120_v4, %v123_v5  ;;  %v139_v13 = vsel %vm133_vm7, %v126_v6, 920167782  ;;  %v135_v23 = vsel %vm133_vm7, %v123_v5, 2102212464 }
  0x49   :  { %v140_v20 = vsel %vm132_vm6, %v123_v5, %v139_v13  ;;  %v143_v25 = vsel %vm133_vm7, %v129_v12, 1326507024  ;;  %v134_v27 = vsel %vm130_vm4, %v114_v19, %v117_v63  ;;  %v136_v28 = vsel %vm132_vm6, %v120_v4, %v135_v23 }
  0x4a   :  { %v141_v24 = vsel %vm131_vm5, %v138_v9, %v140_v20  ;;  %v144_v29 = vsel %vm132_vm6, %v126_v6, %v143_v25  ;;  %v229_v30 = vshrl.u32 %v2150_v55, %v2233_v44  ;;  %v137_v31 = vsel %vm131_vm5, %v134_v27, %v136_v28 }
  0x4b   :  { %v145_v32 = vsel %vm131_vm5, %v142_v10, %v144_v29  ;;  %v2275_v33 = vmul.u32.u64.low %v146_v11, %v141_v24  ;;  %v2276_v34 = vmul.u32.u64.high %v146_v11, %v141_v24, %v2275_v33  ;;  %v153_v37 = vmul.u32 %v146_v11, %v137_v31 }
  0x4c   :  { %v2279_v35 = vmul.u32.u64.low %v146_v11, %v145_v32  ;;  %v2280_v36 = vmul.u32.u64.high %v146_v11, %v145_v32, %v2279_v35  ;;  %v219_v38 = vor.u32 8388608, %v218_v26  ;;  %v230_v43 = vor.u32 %v229_v30, %v228_v22 }
  0x4d   :  { %v231_v50 = vshll.u32 %v2150_v55, %v2225_v39  ;;  %v232_v51 = vshrl.u32 %v2151_v58, %v2233_v44  ;;  %v234_v52 = vshll.u32 %v2151_v58, %v2225_v39  ;;  %v235_v54 = vshrl.u32 %v2148_v49, %v2233_v44 }
  0x4e   :  { %v237_v56 = vshll.u32 %v2148_v49, %v2225_v39  ;;  %v238_v57 = vshrl.u32 %v2152_v1, %v2233_v44  ;;  %v240_v59 = vshll.u32 %v2152_v1, %v2225_v39  ;;  %v156_v60 = vadd.s32 1, %v2276_v34 }
  0x4f   :  { %v233_v61 = vor.u32 %v232_v51, %v231_v50  ;;  %v241_v62 = vshrl.u32 %v2153_v7, %v2233_v44  ;;  %vm243_vm8 = vcmp.lt.s32.totalorder %v2257_v17, 1  ;;  %vm155_vm9 = vc.u32 %v2280_v36, %v2275_v33 }
  0x50   :  { %v236_v63 = vor.u32 %v235_v54, %v234_v52  ;;  %v239_v2 = vor.u32 %v238_v57, %v237_v56  ;;  %vm244_vm10 = vcmp.lt.s32.totalorder %v2257_v17, 2  ;;  %v157_v3 = vsel %vm155_vm9, %v156_v60, %v2276_v34 }
  0x51   :  { %v242_v4 = vor.u32 %v241_v62, %v240_v59  ;;  %vm245_vm11 = vcmp.lt.s32.totalorder %v2257_v17, 3  ;;  %vm246_vm12 = vcmp.lt.s32.totalorder %v2257_v17, 4  ;;  %v158_v5 = vadd.s32 %v157_v3, %v153_v37 }
  0x52   :  { %v247_v44 = vsel %vm243_vm8, %v227_v21, %v230_v43  ;;  %v248_v6 = vsel %vm246_vm12, %v236_v63, 2102212464  ;;  %v251_v8 = vsel %vm243_vm8, %v230_v43, %v233_v61  ;;  %v252_v11 = vsel %vm246_vm12, %v239_v2, 920167782 }
  0x53   :  { %v249_v10 = vsel %vm245_vm11, %v233_v61, %v248_v6  ;;  %v255_v12 = vsel %vm243_vm8, %v233_v61, %v236_v63  ;;  %v159_v13 = vadd.s32 536870912, %v158_v5  ;;  %v253_v19 = vsel %vm245_vm11, %v236_v63, %v252_v11 }
  0x54   :  { %v256_v20 = vsel %vm246_vm12, %v242_v4, 1326507024  ;;  %v327_v21 = vand.u32 2139095040, %v2229_v41  ;;  %v254_v22 = vsel %vm244_vm10, %v251_v8, %v253_v19  ;;  %v259_v24 = vshll.u32 %v219_v38, 8 }
  0x55   :  { %v257_v23 = vsel %vm245_vm11, %v239_v2, %v256_v20  ;;  %v451_v25 = vand.u32 31, %v2235_v45  ;;  %v2322_v27 = vshrl.u32 %v159_v13, 30  ;;  %v250_v28 = vsel %vm244_vm10, %v247_v44, %v249_v10 }
  0x56   :  { %v258_v29 = vsel %vm244_vm10, %v255_v12, %v257_v23  ;;  %v2331_v30 = vmul.f32 %v546_v48, %v2203_v0  ;;  %v2337_v38 = vmul.u32.u64.low %v259_v24, %v254_v22  ;;  %v2338_v43 = vmul.u32.u64.high %v259_v24, %v254_v22, %v2337_v38 }
  0x57   :  { %v2333_v34 = vmul.u32.u64.low %v259_v24, %v258_v29  ;;  %v2334_v35 = vmul.u32.u64.high %v259_v24, %v258_v29, %v2333_v34  ;;  %v161_v37 = vshll.u32 %v2322_v27, 30  ;;  %v437_v50 = vand.u32 2147483647, %v2215_v18 }
  0x58   :  { %v266_v17 = vmul.u32 %v259_v24, %v250_v28  ;;  %v2343_v52 = vshrl.u32 %v2235_v45, 5  ;;  %v452_v48 = vsub.s32 32, %v451_v25  ;;  %v454_v56 = vshll.u32 %v2149_v53, %v451_v25 }
  0x59   :  { %v2345_v54 = vsub.s32 %v158_v5, %v161_v37  ;;  %v457_v57 = vshll.u32 %v2150_v55, %v451_v25  ;;  %v460_v59 = vshll.u32 %v2151_v58, %v451_v25  ;;  %vm268_vm13 = vc.u32 %v2334_v35, %v2337_v38 }
  0x5a   :  { %v455_v61 = vshrl.u32 %v2150_v55, %v452_v48  ;;  %v463_v62 = vshll.u32 %v2148_v49, %v451_v25  ;;  %v269_v63 = vadd.s32 1, %v2338_v43  ;;  %v458_v2 = vshrl.u32 %v2151_v58, %v452_v48 }
  0x5b   :  { %v164_v45 = vsub.s32 0, %v2345_v54  ;;  %v461_v3 = vshrl.u32 %v2148_v49, %v452_v48  ;;  %v464_v4 = vshrl.u32 %v2152_v1, %v452_v48  ;;  %v328_v5 = vshrl.u32 %v327_v21, 23 }
  0x5c   :  { %v270_v8 = vsel %vm268_vm13, %v269_v63, %v2338_v43  ;;  %v456_v11 = vor.u32 %v455_v61, %v454_v56  ;;  %v467_v12 = vshrl.u32 %v2153_v7, %v452_v48  ;;  %v459_v19 = vor.u32 %v458_v2, %v457_v57 }
  0x5d   :  { %v1843_v6 = vmin.u32 %v164_v45, %v2345_v54  ;;  %v271_v10 = vadd.s32 %v270_v8, %v266_v17  ;;  %v462_v20 = vor.u32 %v461_v3, %v460_v59  ;;  %vm469_vm15 = vcmp.lt.s32.totalorder %v2343_v52, 1 }
  0x5e   :  { %vm471_vm1 = vcmp.lt.s32.totalorder %v2343_v52, 3  ;;  %vm472_vm2 = vcmp.lt.s32.totalorder %v2343_v52, 4  ;;  %v453_v24 = vshrl.u32 %v2149_v53, %v452_v48  ;;  %vm470_vm3 = vcmp.lt.s32.totalorder %v2343_v52, 2 }
  0x5f   :  { %v166_v13 = vclz %v1843_v6  ;;  %v272_v21 = vadd.s32 536870912, %v271_v10  ;;  %v481_v37 = vsel %vm469_vm15, %v459_v19, %v462_v20  ;;  %v548_v48 = vstv %s2361_s20 }
  0x60   :  { %v473_v57 = vsel %vm469_vm15, %v453_v24, %v456_v11  ;;  %v154_v2 = vadd.s32 %v2275_v33, %v2280_v36  ;;  %vm2485_vm8 = vcmp.le.f32.partialorder %v98_v47, 0.7853982  ;;  %vm213_vm9 = vcmp.lt.s32.totalorder %v2213_v16, 0 }
  0x61   :  { %v1844_v23 = vadd.s32 4294967294, %v166_v13  ;;  %v2377_v28 = vshrl.u32 %v272_v21, 30  ;;  %vm2498_vm10 = vcmp.le.f32.partialorder %v211_v14, 0.7853982  ;;  %vm439_vm12 = vcmp.lt.s32.totalorder %v2215_v18, 0 }
  0x63   :  { %vm1845_vm4 = vcmp.lt.s32.totalorder %v1844_v23, 0 }
  0x64   :  { %v169_v43 = vsel %vm1845_vm4, 0, %v1844_v23 }
  0x65   :  { %v174_v56 = vsub.s32 4294967266, %v169_v43  ;;  %v171_v13 = vshll.u32 %v2345_v54, %v169_v43 }
  0xbf   :  { %v61_v39 = vpop.xlane.xlu0 %60 }
  0xc0   :  { %v63_v9 = vcvt.f32.s32 %v61_v39  ;;  %v466_v39 = vshll.u32 %v2152_v1, %v451_v25 }
  0xc2   :  { %v64_v31 = vshll.u32 %v63_v9, 16  ;;  %v444_v9 = vand.u32 8388607, %v437_v50  ;;  %v468_v22 = vor.u32 %v467_v12, %v466_v39  ;;  %v885_v39 = vstv %s2370_s21 }
  0xc3   :  { %v59_v26 = vpop.xlane.xlu0 %58  ;;  %v887_v12 = vstv %s2388_s22 }
  0xc4   :  { %v62_v32 = vcvt.f32.s32 %v59_v26  ;;  %v1854_v26 = vadd.s32 4294967169, %v328_v5  ;;  %v445_v29 = vor.u32 8388608, %v444_v9  ;;  %v482_v17 = vsel %vm472_vm2, %v468_v22, 1326507024 }
  0xc5   :  { %v170_v5 = vsub.s32 32, %v169_v43  ;;  %v175_v9 = vadd.s32 127, %v174_v56 }
  0xc6   :  { %v65_v51 = vadd.s32 %v64_v31, %v62_v32  ;;  %v474_v31 = vsel %vm472_vm2, %v462_v20, 2102212464  ;;  %v477_v32 = vsel %vm469_vm15, %v456_v11, %v459_v19  ;;  %v485_v63 = vshll.u32 %v445_v29, 8 }
  0xc7   :  { %v475_v59 = vsel %vm471_vm1, %v459_v19, %v474_v31  ;;  %v334_v3 = vadd.s32 1, %v1854_v26  ;;  %v172_v19 = vshrl.u32 %v154_v2, %v170_v5  ;;  %v176_v52 = vshll.u32 %v175_v9, 23 }
  0xc8   :  { %v1839_v60 = vadd.s32 4294967295, %v65_v51  ;;  %v274_v51 = vshll.u32 %v2377_v28, 30  ;;  %v267_v9 = vadd.s32 %v2337_v38, %v2334_v35 }
  0xc9   :  { %vm335_vm5 = vcmp.gt.s32.totalorder %v334_v3, 0  ;;  %v173_v29 = vor.u32 %v172_v19, %v171_v13  ;;  %v177_v31 = vor.u32 4788187, %v176_v52 }
  0xca   :  { %vm69_vm14 = vcmp.eq.s32.totalorder %v2227_v40, %v1839_v60  ;;  %v465_v40 = vor.u32 %v464_v4, %v463_v62  ;;  %v2400_v61 = vsub.s32 %v271_v10, %v274_v51  ;;  %v2411_v4 = vadd.f32 %v661_v42, %v2238_v46 }
  0xcb   :  { %v70_v44 = vsel %vm69_vm14, %v2203_v0, 0.0  ;;  %v476_v10 = vsel %vm470_vm3, %v473_v57, %v475_v59  ;;  %v2426_v42 = vadd.f32 %v548_v48, %v2331_v30  ;;  %v886_v46 = vmul.f32 %v885_v39, %v2203_v0 }
  0xcc   :  { %71 = vadd.xlane.f32.xlu1 %v70_v44  ;;  %v478_v25 = vsel %vm472_vm2, %v465_v40, 920167782  ;;  %v483_v60 = vsel %vm471_vm1, %v465_v40, %v482_v17  ;;  %v277_v44 = vsub.s32 0, %v2400_v61  ;;  %v666_v36 = vand.u32 2139095040, %v2411_v4 }
  0xcd   :  { %v479_v34 = vsel %vm471_vm1, %v462_v20, %v478_v25  ;;  %v484_v45 = vsel %vm470_vm3, %v481_v37, %v483_v60  ;;  %v492_v20 = vmul.u32 %v485_v63, %v476_v10  ;;  %v336_v25 = vsel %vm335_vm5, %v334_v3, 0 }
  0xce   :  { %v480_v62 = vsel %vm470_vm3, %v477_v32, %v479_v34  ;;  %v2415_v6 = vmul.u32.u64.low %v485_v63, %v484_v45  ;;  %v2416_v8 = vmul.u32.u64.high %v485_v63, %v484_v45, %v2415_v6  ;;  %v1849_v33 = vmin.u32 %v277_v44, %v2400_v61 }
  0xcf   :  { %v2420_v11 = vmul.u32.u64.low %v485_v63, %v480_v62  ;;  %v2421_v40 = vmul.u32.u64.high %v485_v63, %v480_v62, %v2420_v11  ;;  %v667_v23 = vshrl.u32 %v666_v36, 23  ;;  %v553_v30 = vand.u32 2139095040, %v2426_v42 }
  0xd0   :  { %v279_v21 = vclz %v1849_v33  ;;  %v2435_v26 = vadd.f32 %v887_v12, %v886_v46  ;;  %v338_v37 = vand.u32 31, %v336_v25  ;;  %v324_v51 = vand.u32 2147483647, %v2229_v41 }
  0xd1   :  { %vm494_vm6 = vc.u32 %v2416_v8, %v2420_v11  ;;  %v495_v22 = vadd.s32 1, %v2421_v40  ;;  %v1872_v43 = vadd.s32 4294967169, %v667_v23  ;;  %v554_v17 = vshrl.u32 %v553_v30, 23 }
  0xd2   :  { %v1850_v54 = vadd.s32 4294967294, %v279_v21  ;;  %v892_v48 = vand.u32 2139095040, %v2435_v26  ;;  %v178_v56 = vand.u32 2147483647, %v177_v31  ;;  %v180_v57 = vcvt.s32.f32 %v173_v29 }
  0xd3   :  { %v496_v24 = vsel %vm494_vm6, %v495_v22, %v2421_v40  ;;  %v2154_v60 = vmov 0.0   ;;  %v339_v63 = vsub.s32 32, %v338_v37  ;;  %v2448_v2 = vadd.s32 1, %v1872_v43 }
  0xd4   :  { %v497_v32 = vadd.s32 %v496_v24, %v492_v20  ;;  %vm1851_vm7 = vcmp.lt.s32.totalorder %v1850_v54, 0  ;;  %v2445_v62 = vsel %vm51_vm0, 1.0, %v2154_v60  ;;  %v2452_v39 = vand.u32 8388607, %v324_v51 }
  0xd5   :  { %v282_v3 = vsel %vm1851_vm7, 0, %v1850_v54  ;;  %v2454_v5 = vadd.s32 4294967169, %v554_v17  ;;  %v2456_v44 = vshrl.u32 %v892_v48, 23  ;;  %v181_v6 = vmul.f32 %v180_v57, %v178_v56 }
  0xd6   :  { %v498_v34 = vadd.s32 536870912, %v497_v32  ;;  %v772_v40 = vstv %s2437_s23  ;;  %v283_v33 = vsub.s32 32, %v282_v3  ;;  %v2463_v36 = vshrl.u32 %v336_v25, 5 }
  0xd7   :  { %v340_v46 = vshrl.u32 %v2149_v53, %v339_v63  ;;  %v341_v12 = vshll.u32 %v2149_v53, %v338_v37  ;;  %v287_v13 = vsub.s32 4294967266, %v282_v3  ;;  %v493_v19 = vadd.s32 %v2420_v11, %v2416_v8 }
  0xd8   :  { %v2441_v59 = vshrl.u32 %v498_v34, 30  ;;  %v342_v20 = vshrl.u32 %v2150_v55, %v339_v63  ;;  %v344_v52 = vshll.u32 %v2150_v55, %v338_v37  ;;  %vm100_vm0 = vcmp.lt.s32.totalorder %v2211_v15, 0 }
  0xd9   :  { %v332_v38 = vor.u32 8388608, %v2452_v39  ;;  %v345_v21 = vshrl.u32 %v2151_v58, %v339_v63  ;;  %v182_v22 = vxor.u32 2147483648, %v181_v6  ;;  %v184_v23 = vsub.s32 4, %v2322_v27 }
  0xda   :  { %v500_v45 = vshll.u32 %v2441_v59, 30  ;;  %v284_v24 = vshll.u32 %v2400_v61, %v282_v3  ;;  %v347_v25 = vshll.u32 %v2151_v58, %v338_v37  ;;  %v285_v8 = vshrl.u32 %v267_v9, %v283_v33 }
  0xdb   :  { %v348_v11 = vshrl.u32 %v2148_v49, %v339_v63  ;;  %v350_v30 = vshll.u32 %v2148_v49, %v338_v37  ;;  %v351_v29 = vshrl.u32 %v2152_v1, %v339_v63  ;;  %v288_v31 = vadd.s32 127, %v287_v13 }
  0xdc   :  { %v2460_v10 = vsub.s32 %v497_v32, %v500_v45  ;;  %v297_v54 = vsub.s32 4, %v2377_v28  ;;  %v353_v32 = vshll.u32 %v2152_v1, %v338_v37  ;;  %v354_v34 = vshrl.u32 %v2153_v7, %v339_v63 }
  0xdd   :  { %v343_v17 = vor.u32 %v342_v20, %v341_v12  ;;  %v183_v48 = vsel %vm100_vm0, %v182_v22, %v181_v6  ;;  %v185_v37 = vsel %vm100_vm0, %v184_v23, %v2322_v27  ;;  %v346_v47 = vor.u32 %v345_v21, %v344_v52 }
  0xde   :  { %v503_v35 = vsub.s32 0, %v2460_v10  ;;  %v349_v60 = vor.u32 %v348_v11, %v347_v25  ;;  %v352_v45 = vor.u32 %v351_v29, %v350_v30  ;;  %vm356_vm11 = vcmp.lt.s32.totalorder %v2463_v36, 1 }
  0xdf   :  { %v2503_v63 = vor.u32 %v285_v8, %v284_v24  ;;  %v289_v3 = vshll.u32 %v288_v31, 23  ;;  %v298_v39 = vsel %vm213_vm9, %v297_v54, %v2377_v28  ;;  %v355_v27 = vor.u32 %v354_v34, %v353_v32 }
  0xe0   :  { %v1861_v43 = vmin.u32 %v503_v35, %v2460_v10  ;;  %v187_v14 = vsel %vm2485_vm8, 0, %v185_v37  ;;  %v523_v9 = vsub.s32 4, %v2441_v59  ;;  %vm358_vm13 = vcmp.lt.s32.totalorder %v2463_v36, 3 }
  0xe1   :  { %vm357_vm14 = vcmp.lt.s32.totalorder %v2463_v36, 2  ;;  %vm359_vm15 = vcmp.lt.s32.totalorder %v2463_v36, 4  ;;  %v360_v33 = vsel %vm356_vm11, %v340_v46, %v343_v17  ;;  %v364_v28 = vsel %vm356_vm11, %v343_v17, %v346_v47 }
  0xe2   :  { %v505_v57 = vclz %v1861_v43  ;;  %v361_v12 = vsel %vm359_vm15, %v349_v60, 2102212464  ;;  %v365_v13 = vsel %vm359_vm15, %v352_v45, 920167782  ;;  %v368_v20 = vsel %vm356_vm11, %v346_v47, %v349_v60 }
  0xe3   :  { %v362_v35 = vsel %vm358_vm13, %v346_v47, %v361_v12  ;;  %v366_v21 = vsel %vm358_vm13, %v349_v60, %v365_v13  ;;  %v369_v22 = vsel %vm359_vm15, %v355_v27, 1326507024  ;;  %v290_v23 = vor.u32 4788187, %v289_v3 }
  0xe4   :  { %v1862_v6 = vadd.s32 4294967294, %v505_v57  ;;  %v300_v46 = vsel %vm2498_vm10, 0, %v298_v39  ;;  %v367_v11 = vsel %vm357_vm14, %v364_v28, %v366_v21  ;;  %v370_v30 = vsel %vm358_vm13, %v352_v45, %v369_v22 }
  0xe5   :  { %v372_v29 = vshll.u32 %v332_v38, 8  ;;  %v363_v32 = vsel %vm357_vm14, %v360_v33, %v362_v35  ;;  %v371_v34 = vsel %vm357_vm14, %v368_v20, %v370_v30  ;;  %v186_v47 = vsel %vm2485_vm8, %v2211_v15, %v183_v48 }
  0xe6   :  { %vm1863_vm1 = vcmp.lt.s32.totalorder %v1862_v6, 0  ;;  %v191_v38 = vadd.s32 3, %v187_v14  ;;  %vm2550_vm2 = vcmp.le.f32.partialorder %v437_v50, 0.7853982  ;;  %v293_v57 = vcvt.s32.f32 %v2503_v63 }
  0xe7   :  { %v508_v52 = vsel %vm1863_vm1, 0, %v1862_v6  ;;  %v2538_v43 = vmul.u32.u64.low %v372_v29, %v371_v34  ;;  %v2539_v17 = vmul.u32.u64.high %v372_v29, %v371_v34, %v2538_v43  ;;  %v304_v60 = vadd.s32 3, %v300_v46 }
  0xe8   :  { %v509_v24 = vsub.s32 32, %v508_v52  ;;  %v513_v25 = vsub.s32 4294967266, %v508_v52  ;;  %v510_v8 = vshll.u32 %v2460_v10, %v508_v52  ;;  %v524_v45 = vsel %vm439_vm12, %v523_v9, %v2441_v59 }
  0xe9   :  { %v2541_v37 = vmul.u32.u64.low %v372_v29, %v367_v11  ;;  %v2542_v10 = vmul.u32.u64.high %v372_v29, %v367_v11, %v2541_v37  ;;  %vm674_vm3 = vcmp.gt.s32.totalorder %v2448_v2, 0  ;;  %v291_v61 = vand.u32 2147483647, %v290_v23 }
  0xea   :  { %v511_v31 = vshrl.u32 %v493_v19, %v509_v24  ;;  %v514_v54 = vadd.s32 127, %v513_v25  ;;  %v379_v3 = vmul.u32 %v372_v29, %v363_v32  ;;  %v675_v50 = vsel %vm674_vm3, %v2448_v2, 0 }
  0xeb   :  { %2002 = vcosq.f32 %v186_v47  ;;  %vm381_vm4 = vc.u32 %v2539_v17, %v2541_v37  ;;  %v382_v63 = vadd.s32 1, %v2542_v10  ;;  %v2563_v27 = vand.u32 3, %v191_v38 }
  0xec   :  { %v515_v36 = vshll.u32 %v514_v54, 23  ;;  %v512_v48 = vor.u32 %v511_v31, %v510_v8  ;;  %2004 = vsinq.f32 %v186_v47  ;;  %v526_v59 = vsel %vm2550_vm2, 0, %v524_v45 }
  0xed   :  { %v2570_v14 = vmul.f32 %v772_v40, %v2203_v0  ;;  %v85_v6 = vstv %s2527_s24  ;;  %v2573_v9 = vand.u32 3, %v304_v60  ;;  %v383_v2 = vsel %vm381_vm4, %v382_v63, %v2542_v10 }
  0xee   :  { %v516_v39 = vor.u32 4788187, %v515_v36  ;;  %v677_v33 = vand.u32 31, %v675_v50  ;;  %v294_v28 = vmul.f32 %v293_v57, %v291_v61  ;;  %v519_v12 = vcvt.s32.f32 %v512_v48 }
  0xef   :  { %v384_v13 = vadd.s32 %v383_v2, %v379_v3  ;;  %v663_v20 = vand.u32 2147483647, %v2411_v4  ;;  %v676_v23 = vshrl.u32 %v675_v50, 5  ;;  %v86_v34 = vmul.f32 %v85_v6, %v2203_v0 }
  0xf0   :  { %v517_v52 = vand.u32 2147483647, %v516_v39  ;;  %v678_v35 = vsub.s32 32, %v677_v33  ;;  %v680_v21 = vshll.u32 %v2149_v53, %v677_v33  ;;  %v683_v40 = vshll.u32 %v2150_v55, %v677_v33 }
  0xf1   :  { %v385_v22 = vadd.s32 536870912, %v384_v13  ;;  %v686_v46 = vshll.u32 %v2151_v58, %v677_v33  ;;  %v689_v24 = vshll.u32 %v2148_v49, %v677_v33  ;;  %v692_v30 = vshll.u32 %v2152_v1, %v677_v33 }
  0xf2   :  { %v681_v25 = vshrl.u32 %v2150_v55, %v678_v35  ;;  %v684_v8 = vshrl.u32 %v2151_v58, %v678_v35  ;;  %v687_v11 = vshrl.u32 %v2148_v49, %v678_v35  ;;  %v670_v31 = vand.u32 8388607, %v663_v20 }
  0xf3   :  { %v2587_v29 = vshrl.u32 %v385_v22, 30  ;;  %v690_v54 = vshrl.u32 %v2152_v1, %v678_v35  ;;  %v693_v32 = vshrl.u32 %v2153_v7, %v678_v35  ;;  %v530_v43 = vadd.s32 3, %v526_v59 }
  0xf4   :  { %v682_v10 = vor.u32 %v681_v25, %v680_v21  ;;  %v685_v47 = vor.u32 %v684_v8, %v683_v40  ;;  %v688_v36 = vor.u32 %v687_v11, %v686_v46  ;;  %vm695_vm5 = vcmp.lt.s32.totalorder %v676_v23, 1 }
  0xf5   :  { %v387_v38 = vshll.u32 %v2587_v29, 30  ;;  %v691_v57 = vor.u32 %v690_v54, %v689_v24  ;;  %v2003_v60 = vpop.eup %2002  ;;  %v295_v45 = vxor.u32 2147483648, %v294_v28  ;;  %v520_v61 = vmul.f32 %v519_v12, %v517_v52 }
  0xf6   :  { %v694_v48 = vor.u32 %v693_v32, %v692_v30  ;;  %vm697_vm6 = vcmp.lt.s32.totalorder %v676_v23, 3  ;;  %v2005_v3 = vpop.eup %2004  ;;  %v87_v50 = vstv %s2576_s1  ;;  %v671_v63 = vor.u32 8388608, %v670_v31 }
  0xf7   :  { %v2596_v39 = vsub.s32 %v384_v13, %v387_v38  ;;  %vm698_vm7 = vcmp.lt.s32.totalorder %v676_v23, 4  ;;  %v679_v0 = vshrl.u32 %v2149_v53, %v678_v35  ;;  %vm696_vm0 = vcmp.lt.s32.totalorder %v676_v23, 2 }
  0xf8   :  { %v703_v59 = vsel %vm695_vm5, %v682_v10, %v685_v47  ;;  %v704_v6 = vsel %vm698_vm7, %v691_v57, 920167782  ;;  %v198_v2 = vxor.u32 2147483648, %v2003_v60  ;;  %v700_v21 = vsel %vm698_vm7, %v688_v36, 2102212464 }
  0xf9   :  { %v390_v33 = vsub.s32 0, %v2596_v39  ;;  %v705_v12 = vsel %vm697_vm6, %v688_v36, %v704_v6  ;;  %v296_v52 = vsel %vm213_vm9, %v295_v45, %v294_v28  ;;  %v521_v40 = vxor.u32 2147483648, %v520_v61 }
  0xfa   :  { %v707_v13 = vsel %vm695_vm5, %v685_v47, %v688_v36  ;;  %v708_v22 = vsel %vm698_vm7, %v694_v48, 1326507024  ;;  %v706_v35 = vsel %vm696_vm0, %v703_v59, %v705_v12  ;;  %v711_v25 = vshll.u32 %v671_v63, 8 }
  0xfb   :  { %v1855_v46 = vmin.u32 %v390_v33, %v2596_v39  ;;  %v709_v24 = vsel %vm697_vm6, %v691_v57, %v708_v22  ;;  %v699_v8 = vsel %vm695_vm5, %v679_v0, %v682_v10  ;;  %v701_v11 = vsel %vm697_vm6, %v685_v47, %v700_v21 }
  0xfc   :  { %v710_v30 = vsel %vm696_vm0, %v707_v13, %v709_v24  ;;  %v560_v31 = vadd.s32 1, %v2454_v5  ;;  %v2612_v28 = vadd.f32 %v87_v50, %v86_v34  ;;  %vm194_vm8 = vcmp.eq.s32.totalorder %v2563_v27, 0 }
  0xfd   :  { %vm197_vm9 = vcmp.eq.s32.totalorder %v2563_v27, 2  ;;  %v392_v54 = vclz %v1855_v46  ;;  %v2616_v32 = vmul.u32.u64.low %v711_v25, %v710_v30  ;;  %v2617_v38 = vmul.u32.u64.high %v711_v25, %v710_v30, %v2616_v32 }
  0xfe   :  { %v2619_v36 = vmul.u32.u64.low %v711_v25, %v706_v35  ;;  %v2620_v57 = vmul.u32.u64.high %v711_v25, %v706_v35, %v2619_v36  ;;  %v299_v10 = vsel %vm2498_vm10, %v2213_v16, %v296_v52  ;;  %v522_v5 = vsel %vm439_vm12, %v521_v40, %v520_v61 }
  0xff   :  { %v1856_v34 = vadd.s32 4294967294, %v392_v54  ;;  %v702_v47 = vsel %vm696_vm0, %v699_v8, %v701_v11  ;;  %v195_v45 = vxor.u32 2147483648, %v2005_v3  ;;  %v2629_v48 = vsel %vm197_vm9, %v198_v2, %v2005_v3 }
 0x100   :  { %v2631_v50 = vand.u32 3, %v530_v43  ;;  %vm561_vm11 = vcmp.gt.s32.totalorder %v560_v31, 0  ;;  %v380_v63 = vadd.s32 %v2541_v37, %v2539_v17  ;;  %v550_v0 = vand.u32 2147483647, %v2426_v42 }
 0x101   :  { %vm1857_vm13 = vcmp.lt.s32.totalorder %v1856_v34, 0  ;;  %v562_v56 = vsel %vm561_vm11, %v560_v31, 0  ;;  %2006 = vcosq.f32 %v299_v10  ;;  %v525_v61 = vsel %vm2550_vm2, %v2215_v18, %v522_v5 }
 0x102   :  { %v395_v23 = vsel %vm1857_vm13, 0, %v1856_v34  ;;  %v718_v59 = vmul.u32 %v711_v25, %v702_v47  ;;  %vm720_vm10 = vc.u32 %v2617_v38, %v2619_v36  ;;  %v2644_v17 = vsel %vm194_vm8, %v2003_v60, %v195_v45 }
 0x103   :  { %v396_v6 = vsub.s32 32, %v395_v23  ;;  %v397_v3 = vshll.u32 %v2596_v39, %v395_v23  ;;  %v400_v43 = vsub.s32 4294967266, %v395_v23  ;;  %2008 = vsinq.f32 %v299_v10 }
 0x104   :  { %v721_v37 = vadd.s32 1, %v2620_v57  ;;  %v564_v2 = vand.u32 31, %v562_v56  ;;  %2010 = vcosq.f32 %v525_v61  ;;  %vm326_vm12 = vcmp.lt.s32.totalorder %v2229_v41, 0 }
 0x105   :  { %v398_v19 = vshrl.u32 %v380_v63, %v396_v6  ;;  %v401_v33 = vadd.s32 127, %v400_v43  ;;  %v557_v39 = vand.u32 8388607, %v550_v0  ;;  %v2651_v12 = vshrl.u32 %v562_v56, 5 }
 0x106   :  { %v722_v21 = vsel %vm720_vm10, %v721_v37, %v2620_v57  ;;  %v565_v52 = vsub.s32 32, %v564_v2  ;;  %v567_v60 = vshll.u32 %v2149_v53, %v564_v2  ;;  %v570_v46 = vshll.u32 %v2150_v55, %v564_v2 }
 0x107   :  { %v399_v40 = vor.u32 %v398_v19, %v397_v3  ;;  %v402_v13 = vshll.u32 %v401_v33, 23  ;;  %v723_v22 = vadd.s32 %v722_v21, %v718_v59  ;;  %vm193_vm14 = vcmp.lt.s32.totalorder %v2563_v27, 2 }
 0x108   :  { %v568_v35 = vshrl.u32 %v2150_v55, %v565_v52  ;;  %v571_v24 = vshrl.u32 %v2151_v58, %v565_v52  ;;  %v573_v25 = vshll.u32 %v2151_v58, %v564_v2  ;;  %v574_v8 = vshrl.u32 %v2148_v49, %v565_v52 }
 0x109   :  { %v403_v11 = vor.u32 4788187, %v402_v13  ;;  %v406_v30 = vcvt.s32.f32 %v399_v40  ;;  %v724_v31 = vadd.s32 536870912, %v723_v22  ;;  %v576_v54 = vshll.u32 %v2148_v49, %v564_v2 }
 0x10a   :  { %2012 = vsinq.f32 %v525_v61  ;;  %vm2663_vm15 = vcmp.le.f32.partialorder %v324_v51, 0.7853982  ;;  %v410_v57 = vsub.s32 4, %v2587_v29  ;;  %v558_v10 = vor.u32 8388608, %v557_v39 }
 0x10b   :  { %v577_v5 = vshrl.u32 %v2152_v1, %v565_v52  ;;  %vm307_vm1 = vcmp.eq.s32.totalorder %v2573_v9, 0  ;;  %vm310_vm2 = vcmp.eq.s32.totalorder %v2573_v9, 2  ;;  %v404_v34 = vand.u32 2147483647, %v403_v11  ;;  %v2007_v51 = vpop.eup %2006 }
 0x10c   :  { %v2671_v47 = vshrl.u32 %v724_v31, 30  ;;  %v579_v45 = vshll.u32 %v2152_v1, %v564_v2  ;;  %v580_v63 = vshrl.u32 %v2153_v7, %v565_v52  ;;  %v569_v56 = vor.u32 %v568_v35, %v567_v60 }
 0x10d   :  { %v572_v61 = vor.u32 %v571_v24, %v570_v46  ;;  %v575_v23 = vor.u32 %v574_v8, %v573_v25  ;;  %v578_v59 = vor.u32 %v577_v5, %v576_v54  ;;  %v407_v6 = vmul.f32 %v406_v30, %v404_v34  ;;  %v2009_v37 = vpop.eup %2008 }
 0x10e   :  { %v726_v3 = vshll.u32 %v2671_v47, 30  ;;  %v581_v43 = vor.u32 %v580_v63, %v579_v45  ;;  %vm582_vm3 = vcmp.lt.s32.totalorder %v2651_v12, 1  ;;  %v411_v19 = vsel %vm326_vm12, %v410_v57, %v2587_v29  ;;  %v2682_v39 = vpop.eup %2010 }
 0x10f   :  { %v566_v2 = vshrl.u32 %v2149_v53, %v565_v52  ;;  %vm585_vm4 = vcmp.lt.s32.totalorder %v2651_v12, 4  ;;  %v598_v33 = vshll.u32 %v558_v10, 8  ;;  %vm583_vm5 = vcmp.lt.s32.totalorder %v2651_v12, 2 }
 0x110   :  { %v2684_v21 = vsub.s32 %v723_v22, %v726_v3  ;;  %vm584_vm6 = vcmp.lt.s32.totalorder %v2651_v12, 3  ;;  %v587_v60 = vsel %vm585_vm4, %v575_v23, 2102212464  ;;  %v408_v40 = vxor.u32 2147483648, %v407_v6 }
 0x111   :  { %v590_v13 = vsel %vm582_vm3, %v569_v56, %v572_v61  ;;  %v591_v46 = vsel %vm585_vm4, %v578_v59, 920167782  ;;  %v595_v29 = vsel %vm585_vm4, %v581_v43, 1326507024  ;;  %v308_v35 = vxor.u32 2147483648, %v2009_v37 }
 0x112   :  { %v311_v52 = vxor.u32 2147483648, %v2007_v51  ;;  %v729_v24 = vsub.s32 0, %v2684_v21  ;;  %v594_v25 = vsel %vm582_vm3, %v572_v61, %v575_v23  ;;  %v586_v22 = vsel %vm582_vm3, %v566_v2, %v569_v56 }
 0x113   :  { %v588_v8 = vsel %vm584_vm6, %v572_v61, %v587_v60  ;;  %v592_v11 = vsel %vm584_vm6, %v575_v23, %v591_v46  ;;  %v596_v30 = vsel %vm584_vm6, %v578_v59, %v595_v29  ;;  %v2699_v31 = vsel %vm193_vm14, %v2644_v17, %v2629_v48 }
 0x114   :  { %vm306_vm7 = vcmp.lt.s32.totalorder %v2573_v9, 2  ;;  %v413_v54 = vsel %vm2663_vm15, 0, %v411_v19  ;;  %v1873_v57 = vmin.u32 %v729_v24, %v2684_v21  ;;  %v593_v10 = vsel %vm583_vm5, %v590_v13, %v592_v11  ;;  %v2013_v5 = vpop.eup %2012 }
 0x115   :  { %v409_v34 = vsel %vm326_vm12, %v408_v40, %v407_v6  ;;  %v597_v45 = vsel %vm583_vm5, %v594_v25, %v596_v30  ;;  %v2711_v27 = vmul.u32.u64.low %v598_v33, %v593_v10  ;;  %v2712_v48 = vmul.u32.u64.high %v598_v33, %v593_v10, %v2711_v27 }
 0x116   :  { %vm536_vm0 = vcmp.eq.s32.totalorder %v2631_v50, 2  ;;  %vm665_vm8 = vcmp.lt.s32.totalorder %v2411_v4, 0  ;;  %v731_v17 = vclz %v1873_v57  ;;  %v589_v63 = vsel %vm583_vm5, %v586_v22, %v588_v8 }
 0x117   :  { %v309_v56 = vsel %vm307_vm1, %v2007_v51, %v308_v35  ;;  %v312_v61 = vsel %vm310_vm2, %v311_v52, %v2009_v37  ;;  %vm533_vm9 = vcmp.eq.s32.totalorder %v2631_v50, 0  ;;  %v412_v6 = vsel %vm2663_vm15, %v2229_v41, %v409_v34 }
 0x118   :  { %v2724_v23 = vmul.u32.u64.low %v598_v33, %v597_v45  ;;  %v2725_v59 = vmul.u32.u64.high %v598_v33, %v597_v45, %v2724_v23  ;;  %v417_v3 = vadd.s32 3, %v413_v54  ;;  %v1874_v43 = vadd.s32 4294967294, %v731_v17 }
 0x119   :  { %v1884_v12 = vadd.s32 4294967169, %v2456_v44  ;;  %v537_v51 = vxor.u32 2147483648, %v2682_v39  ;;  %v749_v19 = vsub.s32 4, %v2671_v47  ;;  %v605_v37 = vmul.u32 %v598_v33, %v589_v63 }
 0x11a   :  { %v608_v2 = vadd.s32 1, %v2712_v48  ;;  %v719_v60 = vadd.s32 %v2619_v36, %v2617_v38  ;;  %vm1875_vm11 = vcmp.lt.s32.totalorder %v1874_v43, 0  ;;  %v889_v32 = vand.u32 2147483647, %v2435_v26 }
 0x11b   :  { %v899_v40 = vadd.s32 1, %v1884_v12  ;;  %v534_v13 = vxor.u32 2147483648, %v2013_v5  ;;  %2014 = vcosq.f32 %v412_v6  ;;  %v734_v46 = vsel %vm1875_vm11, 0, %v1874_v43 }
 0x11c   :  { %vm607_vm13 = vc.u32 %v2725_v59, %v2711_v27  ;;  %v735_v44 = vsub.s32 32, %v734_v46  ;;  %v736_v33 = vshll.u32 %v2684_v21, %v734_v46  ;;  %v739_v29 = vsub.s32 4294967266, %v734_v46 }
 0x11d   :  { %v609_v35 = vsel %vm607_vm13, %v608_v2, %v2712_v48  ;;  %2016 = vsinq.f32 %v412_v6  ;;  %v750_v38 = vsel %vm665_vm8, %v749_v19, %v2671_v47  ;;  %vm900_vm10 = vcmp.gt.s32.totalorder %v899_v40, 0 }
 0x11e   :  { %v610_v36 = vadd.s32 %v609_v35, %v605_v37  ;;  %v737_v52 = vshrl.u32 %v719_v60, %v735_v44  ;;  %v740_v24 = vadd.s32 127, %v739_v29  ;;  %v896_v25 = vand.u32 8388607, %v889_v32 }
 0x11f   :  { %v901_v22 = vsel %vm900_vm10, %v899_v40, 0  ;;  %v2752_v21 = vsel %vm306_vm7, %v309_v56, %v312_v61  ;;  %vm2756_vm12 = vcmp.le.f32.partialorder %v663_v20, 0.7853982  ;;  %v774_v10 = vstv %s2731_s25 }
 0x120   :  { %v611_v11 = vadd.s32 536870912, %v610_v36  ;;  %v903_v47 = vand.u32 31, %v901_v22  ;;  %v738_v30 = vor.u32 %v737_v52, %v736_v33  ;;  %v741_v54 = vshll.u32 %v740_v24, 23 }
 0x121   :  { %v752_v57 = vsel %vm2756_vm12, 0, %v750_v38  ;;  %v2765_v9 = vsel %vm536_vm0, %v537_v51, %v2013_v5  ;;  %v2767_v34 = vand.u32 3, %v417_v3  ;;  %v2772_v48 = vsel %vm533_vm9, %v2682_v39, %v534_v13 }
 0x122   :  { %v612_v45 = vshrl.u32 %v611_v11, 30  ;;  %v904_v20 = vsub.s32 32, %v903_v47  ;;  %v742_v17 = vor.u32 4788187, %v741_v54  ;;  %v745_v63 = vcvt.s32.f32 %v738_v30 }
 0x123   :  { %vm552_vm14 = vcmp.lt.s32.totalorder %v2426_v42, 0  ;;  %v897_v56 = vor.u32 8388608, %v896_v25  ;;  %v2775_v61 = vadd.s32 3, %v752_v57  ;;  %v2778_v5 = vadd.f32 %v774_v10, %v2570_v14 }
 0x124   :  { %v613_v23 = vshll.u32 %v612_v45, 30  ;;  %v1111_v6 = vstv %s2741_s26  ;;  %v743_v3 = vand.u32 2147483647, %v742_v17  ;;  %v906_v43 = vshll.u32 %v2149_v53, %v903_v47 }
 0x125   :  { %v907_v12 = vshrl.u32 %v2150_v55, %v904_v20  ;;  %v909_v39 = vshll.u32 %v2150_v55, %v903_v47  ;;  %v2784_v51 = vpop.eup %2014  ;;  %v910_v37 = vshrl.u32 %v2151_v58, %v904_v20  ;;  %v912_v2 = vshll.u32 %v2151_v58, %v903_v47 }
 0x126   :  { %v2786_v19 = vsub.s32 %v610_v36, %v613_v23  ;;  %v913_v60 = vshrl.u32 %v2148_v49, %v904_v20  ;;  %v746_v14 = vmul.f32 %v745_v63, %v743_v3  ;;  %v606_v40 = vadd.s32 %v2711_v27, %v2725_v59 }
 0x127   :  { %v902_v13 = vshrl.u32 %v901_v22, 5  ;;  %v2793_v46 = vshll.u32 %v897_v56, 8  ;;  %v2795_v44 = vpop.eup %2016  ;;  %v636_v29 = vsub.s32 4, %v612_v45  ;;  %v905_v35 = vshrl.u32 %v2149_v53, %v904_v20 }
 0x128   :  { %v616_v33 = vsub.s32 0, %v2786_v19  ;;  %v915_v38 = vshll.u32 %v2148_v49, %v903_v47  ;;  %v747_v36 = vxor.u32 2147483648, %v746_v14  ;;  %v916_v52 = vshrl.u32 %v2152_v1, %v904_v20 }
 0x129   :  { %v918_v24 = vshll.u32 %v2152_v1, %v903_v47  ;;  %v919_v25 = vshrl.u32 %v2153_v7, %v904_v20  ;;  %v908_v59 = vor.u32 %v907_v12, %v906_v43  ;;  %v911_v22 = vor.u32 %v910_v37, %v909_v39 }
 0x12a   :  { %v1867_v27 = vmin.u32 %v616_v33, %v2786_v19  ;;  %v914_v11 = vor.u32 %v913_v60, %v912_v2  ;;  %v748_v30 = vsel %vm665_vm8, %v747_v36, %v746_v14  ;;  %v917_v54 = vor.u32 %v916_v52, %v915_v38 }
 0x12b   :  { %v920_v57 = vor.u32 %v919_v25, %v918_v24  ;;  %vm921_vm15 = vcmp.lt.s32.totalorder %v902_v13, 1  ;;  %vm420_vm1 = vcmp.eq.s32.totalorder %v2767_v34, 0  ;;  %v421_v10 = vxor.u32 2147483648, %v2795_v44 }
 0x12c   :  { %vm423_vm2 = vcmp.eq.s32.totalorder %v2767_v34, 2  ;;  %v424_v47 = vxor.u32 2147483648, %v2784_v51  ;;  %vm2812_vm3 = vcmp.le.f32.partialorder %v550_v0, 0.7853982  ;;  %v618_v17 = vclz %v1867_v27 }
 0x12d   :  { %v637_v63 = vsel %vm552_vm14, %v636_v29, %v612_v45  ;;  %v751_v56 = vsel %vm2756_vm12, %v2411_v4, %v748_v30  ;;  %vm922_vm4 = vcmp.lt.s32.totalorder %v902_v13, 2  ;;  %vm923_vm5 = vcmp.lt.s32.totalorder %v902_v13, 3 }
 0x12e   :  { %vm924_vm6 = vcmp.lt.s32.totalorder %v902_v13, 4  ;;  %vm532_vm7 = vcmp.lt.s32.totalorder %v2631_v50, 2  ;;  %v1868_v23 = vadd.s32 4294967294, %v618_v17  ;;  %v925_v3 = vsel %vm921_vm15, %v905_v35, %v908_v59 }
 0x12f   :  { %v926_v0 = vsel %vm924_vm6, %v914_v11, 2102212464  ;;  %v929_v43 = vsel %vm921_vm15, %v908_v59, %v911_v22  ;;  %vm419_vm0 = vcmp.lt.s32.totalorder %v2767_v34, 2  ;;  %v930_v45 = vsel %vm924_vm6, %v917_v54, 920167782 }
 0x130   :  { %v927_v12 = vsel %vm923_vm5, %v911_v22, %v926_v0  ;;  %v933_v39 = vsel %vm921_vm15, %v911_v22, %v914_v11  ;;  %v934_v8 = vsel %vm924_vm6, %v920_v57, 1326507024  ;;  %vm190_vm8 = vweird.f32 %v2211_v15  ;;  %v2854_v57 = vld [vmem:[#allocation8] sm:$0xff] }
 0x131   :  { %vm303_vm9 = vweird.f32 %v2213_v16  ;;  %2018 = vcosq.f32 %v751_v56  ;;  %vm1869_vm11 = vcmp.lt.s32.totalorder %v1868_v23, 0  ;;  %v931_v37 = vsel %vm923_vm5, %v914_v11, %v930_v45 }
 0x132   :  { %v935_v2 = vsel %vm923_vm5, %v917_v54, %v934_v8  ;;  %vm529_vm13 = vweird.f32 %v2215_v18  ;;  %v621_v60 = vsel %vm1869_vm11, 0, %v1868_v23  ;;  %v928_v14 = vsel %vm922_vm4, %v925_v3, %v927_v12 }
 0x133   :  { %v932_v33 = vsel %vm922_vm4, %v929_v43, %v931_v37  ;;  %v936_v29 = vsel %vm922_vm4, %v933_v39, %v935_v2  ;;  %vm416_vm10 = vweird.f32 %v2229_v41  ;;  %v622_v35 = vsub.s32 32, %v621_v60 }
 0x134   :  { %v623_v38 = vshll.u32 %v2786_v19, %v621_v60  ;;  %v626_v36 = vsub.s32 4294967266, %v621_v60  ;;  %v779_v52 = vand.u32 2139095040, %v2778_v5  ;;  %2020 = vsinq.f32 %v751_v56 }
 0x135   :  { %v2841_v24 = vmul.u32.u64.low %v2793_v46, %v936_v29  ;;  %v2842_v25 = vmul.u32.u64.high %v2793_v46, %v936_v29, %v2841_v24  ;;  %v2845_v27 = vmul.u32.u64.low %v2793_v46, %v932_v33  ;;  %v2846_v59 = vmul.u32.u64.high %v2793_v46, %v932_v33, %v2845_v27 }
 0x136   :  { %v624_v13 = vshrl.u32 %v606_v40, %v622_v35  ;;  %v627_v22 = vadd.s32 127, %v626_v36  ;;  %v780_v11 = vshrl.u32 %v779_v52, 23  ;;  %v2849_v30 = vand.u32 3, %v2775_v61 }
 0x137   :  { %v639_v19 = vsel %vm2812_vm3, 0, %v637_v63  ;;  %v776_v54 = vand.u32 2147483647, %v2778_v5  ;;  %v1112_v17 = vmul.f32 %v2854_v57, %v1111_v6  ;;  %v944_v40 = vmul.u32 %v2793_v46, %v928_v14 }
 0x138   :  { %v625_v23 = vor.u32 %v624_v13, %v623_v38  ;;  %v628_v3 = vshll.u32 %v627_v22, 23  ;;  %v1878_v56 = vadd.s32 4294967169, %v780_v11  ;;  %v422_v61 = vsel %vm420_vm1, %v2784_v51, %v421_v10 }
 0x139   :  { %v425_v63 = vsel %vm423_vm2, %v424_v47, %v2795_v44  ;;  %vm946_vm12 = vc.u32 %v2842_v25, %v2845_v27  ;;  %v947_v0 = vadd.s32 1, %v2846_v59  ;;  %v1113_v45 = vstv %s2831_s27 }
 0x13a   :  { %v629_v43 = vor.u32 4788187, %v628_v3  ;;  %v632_v12 = vcvt.s32.f32 %v625_v23  ;;  %v786_v6 = vadd.s32 1, %v1878_v56  ;;  %v539_v46 = vsel %vm532_vm7, %v2772_v48, %v2765_v9 }
 0x13b   :  { %v643_v39 = vadd.s32 3, %v639_v19  ;;  %v948_v51 = vsel %vm946_vm12, %v947_v0, %v2846_v59  ;;  %v783_v10 = vand.u32 8388607, %v776_v54  ;;  %v2876_v44 = vpop.eup %2018  ;;  %v426_v47 = vsel %vm419_vm0, %v422_v61, %v425_v63 }
 0x13c   :  { %v630_v8 = vand.u32 2147483647, %v629_v43  ;;  %v949_v37 = vadd.s32 %v948_v51, %v944_v40  ;;  %vm787_vm15 = vcmp.gt.s32.totalorder %v786_v6, 0  ;;  %v2883_v2 = vsel %vm190_vm8, nan, %v2699_v31 }
 0x13d   :  { %v2888_v50 = vsel %vm303_vm9, nan, %v2752_v21  ;;  %v788_v9 = vsel %vm787_vm15, %v786_v6, 0  ;;  %v2890_v48 = vadd.f32 %v1113_v45, %v1112_v17  ;;  %v2894_v34 = vsel %vm529_vm13, nan, %v539_v46 }
 0x13e   :  { %vm762_vm1 = vcmp.eq.s32.totalorder %v2849_v30, 2  ;;  %v633_v60 = vmul.f32 %v632_v12, %v630_v8  ;;  %v950_v14 = vadd.s32 536870912, %v949_v37  ;;  %v2899_v15 = vsel %vm416_vm10, nan, %v426_v47  ;;  %v2021_v33 = vpop.eup %2020 }
 0x13f   :  { %v2901_v31 = vand.u32 3, %v643_v39  ;;  %v784_v16 = vor.u32 8388608, %v783_v10  ;;  %v790_v21 = vand.u32 31, %v788_v9  ;;  %v2904_v35 = vadd.s32 %v2845_v27, %v2842_v25 }
 0x140   :  { %v634_v29 = vxor.u32 2147483648, %v633_v60  ;;  %v2906_v18 = vshrl.u32 %v950_v14, 30  ;;  %v1115_v38 = vand.u32 2147483647, %v2890_v48  ;;  %vm759_vm2 = vcmp.eq.s32.totalorder %v2849_v30, 0 }
 0x141   :  { %v763_v36 = vxor.u32 2147483648, %v2876_v44  ;;  %v2911_v41 = vshrl.u32 %v788_v9, 5  ;;  %v791_v52 = vsub.s32 32, %v790_v21  ;;  %v1118_v24 = vand.u32 2139095040, %v2890_v48 }
 0x142   :  { %v635_v59 = vsel %vm552_vm14, %v634_v29, %v633_v60  ;;  %v952_v13 = vshll.u32 %v2906_v18, 30  ;;  %v796_v25 = vshll.u32 %v2150_v55, %v790_v21  ;;  %v799_v27 = vshll.u32 %v2151_v58, %v790_v21 }
 0x143   :  { %v760_v22 = vxor.u32 2147483648, %v2021_v33  ;;  %v793_v11 = vshll.u32 %v2149_v53, %v790_v21  ;;  %v794_v19 = vshrl.u32 %v2150_v55, %v791_v52  ;;  %v797_v17 = vshrl.u32 %v2151_v58, %v791_v52 }
 0x144   :  { %v2922_v23 = vsub.s32 %v949_v37, %v952_v13  ;;  %v800_v3 = vshrl.u32 %v2148_v49, %v791_v52  ;;  %v802_v40 = vshll.u32 %v2148_v49, %v790_v21  ;;  %v2926_v56 = vshll.u32 %v784_v16, 8 }
 0x145   :  { %v2930_v61 = vsel %vm762_vm1, %v763_v36, %v2021_v33  ;;  %v638_v63 = vsel %vm2812_vm3, %v2426_v42, %v635_v59  ;;  %vm808_vm14 = vcmp.lt.s32.totalorder %v2911_v41, 1  ;;  %v1119_v0 = vshrl.u32 %v1118_v24, 23 }
 0x146   :  { %vm891_vm4 = vcmp.lt.s32.totalorder %v2435_v26, 0  ;;  %v955_v43 = vsub.s32 0, %v2922_v23  ;;  %v798_v12 = vor.u32 %v797_v17, %v796_v25  ;;  %v801_v6 = vor.u32 %v800_v3, %v799_v27 }
 0x147   :  { %v803_v45 = vshrl.u32 %v2152_v1, %v791_v52  ;;  %v795_v46 = vor.u32 %v794_v19, %v793_v11  ;;  %v805_v39 = vshll.u32 %v2152_v1, %v790_v21  ;;  %v806_v51 = vshrl.u32 %v2153_v7, %v791_v52 }
 0x148   :  { %vm809_vm5 = vcmp.lt.s32.totalorder %v2911_v41, 2  ;;  %vm758_vm3 = vcmp.lt.s32.totalorder %v2849_v30, 2  ;;  %2022 = vcosq.f32 %v638_v63  ;;  %v1885_v20 = vmin.u32 %v955_v43, %v2922_v23 }
 0x149   :  { %v804_v10 = vor.u32 %v803_v45, %v802_v40  ;;  %vm811_vm6 = vcmp.lt.s32.totalorder %v2911_v41, 4  ;;  %2024 = vsinq.f32 %v638_v63  ;;  %vm2947_vm7 = vcmp.le.f32.partialorder %v889_v32, 0.7853982 }
 0x14a   :  { %v792_v8 = vshrl.u32 %v2149_v53, %v791_v52  ;;  %v807_v37 = vor.u32 %v806_v51, %v805_v39  ;;  %vm810_vm0 = vcmp.lt.s32.totalorder %v2911_v41, 3  ;;  %v957_v9 = vclz %v1885_v20 }
 0x14b   :  { %v975_v60 = vsub.s32 4, %v2906_v18  ;;  %v813_v14 = vsel %vm811_vm6, %v801_v6, 2102212464  ;;  %v820_v16 = vsel %vm808_vm14, %v798_v12, %v801_v6  ;;  %v816_v21 = vsel %vm808_vm14, %v795_v46, %v798_v12 }
 0x14c   :  { %v817_v33 = vsel %vm811_vm6, %v804_v10, 920167782  ;;  %v821_v32 = vsel %vm811_vm6, %v807_v37, 1326507024  ;;  %v1896_v29 = vadd.s32 4294967169, %v1119_v0  ;;  %v761_v52 = vsel %vm759_vm2, %v2876_v44, %v760_v22 }
 0x14d   :  { %v1886_v24 = vadd.s32 4294967294, %v957_v9  ;;  %v818_v59 = vsel %vm810_vm0, %v801_v6, %v817_v33  ;;  %v822_v13 = vsel %vm810_vm0, %v804_v10, %v821_v32  ;;  %v812_v27 = vsel %vm808_vm14, %v792_v8, %v795_v46 }
 0x14e   :  { %v814_v11 = vsel %vm810_vm0, %v798_v12, %v813_v14  ;;  %v823_v19 = vsel %vm809_vm5, %v820_v16, %v822_v13  ;;  %v819_v44 = vsel %vm809_vm5, %v816_v21, %v818_v59  ;;  %v976_v63 = vsel %vm891_vm4, %v975_v60, %v2906_v18 }
 0x14f   :  { %vm1887_vm8 = vcmp.lt.s32.totalorder %v1886_v24, 0  ;;  %v2975_v22 = vmul.u32.u64.low %v2926_v56, %v823_v19  ;;  %v2976_v17 = vmul.u32.u64.high %v2926_v56, %v823_v19, %v2975_v22  ;;  %v1125_v0 = vadd.s32 1, %v1896_v29 }
 0x150   :  { %v960_v40 = vsel %vm1887_vm8, 0, %v1886_v24  ;;  %vm646_vm9 = vcmp.eq.s32.totalorder %v2901_v31, 0  ;;  %v815_v45 = vsel %vm809_vm5, %v812_v27, %v814_v11  ;;  %vm649_vm11 = vcmp.eq.s32.totalorder %v2901_v31, 2 }
 0x151   :  { %v961_v43 = vsub.s32 32, %v960_v40  ;;  %v962_v12 = vshll.u32 %v2922_v23, %v960_v40  ;;  %v965_v6 = vsub.s32 4294967266, %v960_v40  ;;  %v978_v8 = vsel %vm2947_vm7, 0, %v976_v63 }
 0x152   :  { %v2988_v39 = vmul.u32.u64.low %v2926_v56, %v819_v44  ;;  %v2989_v51 = vmul.u32.u64.high %v2926_v56, %v819_v44, %v2988_v39  ;;  %v2023_v20 = vpop.eup %2022  ;;  %vm1126_vm13 = vcmp.gt.s32.totalorder %v1125_v0, 0  ;;  %v2998_v41 = vsel %vm758_vm3, %v761_v52, %v2930_v61 }
 0x153   :  { %v963_v18 = vshrl.u32 %v2904_v35, %v961_v43  ;;  %v966_v10 = vadd.s32 127, %v965_v6  ;;  %v2025_v23 = vpop.eup %2024  ;;  %v831_v9 = vmul.u32 %v2926_v56, %v815_v45  ;;  %v1122_v60 = vand.u32 8388607, %v1115_v38 }
 0x154   :  { %vm833_vm10 = vc.u32 %v2976_v17, %v2988_v39  ;;  %v1127_v35 = vsel %vm1126_vm13, %v1125_v0, 0  ;;  %v982_v21 = vadd.s32 3, %v978_v8  ;;  %v834_v33 = vadd.s32 1, %v2989_v51 }
 0x155   :  { %v964_v14 = vor.u32 %v963_v18, %v962_v12  ;;  %v967_v16 = vshll.u32 %v966_v10, 23  ;;  %v1129_v32 = vand.u32 31, %v1127_v35  ;;  %v647_v29 = vxor.u32 2147483648, %v2025_v23 }
 0x156   :  { %v650_v30 = vxor.u32 2147483648, %v2023_v20  ;;  %vm755_vm12 = vweird.f32 %v2411_v4  ;;  %v835_v56 = vsel %vm833_vm10, %v834_v33, %v2989_v51  ;;  %v3008_v52 = vshrl.u32 %v1127_v35, 5 }
 0x157   :  { %v968_v61 = vor.u32 4788187, %v967_v16  ;;  %v1130_v24 = vsub.s32 32, %v1129_v32  ;;  %v1132_v59 = vshll.u32 %v2149_v53, %v1129_v32  ;;  %vm645_vm15 = vcmp.lt.s32.totalorder %v2901_v31, 2 }
 0x158   :  { %v1135_v27 = vshll.u32 %v2150_v55, %v1129_v32  ;;  %v1141_v11 = vshll.u32 %v2148_v49, %v1129_v32  ;;  %v1138_v22 = vshll.u32 %v2151_v58, %v1129_v32  ;;  %v3018_v63 = vand.u32 3, %v982_v21 }
 0x159   :  { %v72_v36 = vpop.xlane.xlu1 %71  ;;  %v969_v13 = vand.u32 2147483647, %v968_v61  ;;  %v1133_v19 = vshrl.u32 %v2150_v55, %v1130_v24  ;;  %v1136_v44 = vshrl.u32 %v2151_v58, %v1130_v24  ;;  %v1142_v43 = vshrl.u32 %v2152_v1, %v1130_v24 }
 0x15a   :  { %v73_v25 = vsub.f32 %v72_v36, %v2854_v57  ;;  %v971_v36 = vcvt.s32.f32 %v964_v14  ;;  %v648_v12 = vsel %vm646_vm9, %v2023_v20, %v647_v29  ;;  %v651_v6 = vsel %vm649_vm11, %v650_v30, %v2025_v23 }
 0x15b   :  { %v1123_v45 = vor.u32 8388608, %v1122_v60  ;;  %v1143_v10 = vor.u32 %v1142_v43, %v1141_v11  ;;  %v1145_v8 = vshrl.u32 %v2153_v7, %v1130_v24  ;;  %vm642_vm1 = vweird.f32 %v2426_v42 }
 0x15c   :  { %v74_v3 = vmul.f32 %v2445_v62, %v73_v25  ;;  %v836_v25 = vadd.s32 %v835_v56, %v831_v9  ;;  %v972_v40 = vmul.f32 %v971_v36, %v969_v13  ;;  %v1137_v9 = vor.u32 %v1136_v44, %v1135_v27 }
 0x15d   :  { %vm1150_vm2 = vcmp.lt.s32.totalorder %v3008_v52, 4  ;;  %vm778_vm14 = vcmp.lt.s32.totalorder %v2778_v5, 0  ;;  %vm1147_vm5 = vcmp.lt.s32.totalorder %v3008_v52, 1  ;;  %vm1149_vm3 = vcmp.lt.s32.totalorder %v3008_v52, 3 }
 0x15e   :  { %v75_v46 = vsub.f32 0.0, %v74_v3  ;;  %v1139_v3 = vshrl.u32 %v2148_v49, %v1130_v24  ;;  %v837_v0 = vadd.s32 536870912, %v836_v25  ;;  %v973_v51 = vxor.u32 2147483648, %v972_v40 }
 0x15f   :  { %v1131_v35 = vshrl.u32 %v2149_v53, %v1130_v24  ;;  %v1156_v21 = vsel %vm1150_vm2, %v1143_v10, 920167782  ;;  %v3044_v33 = vshll.u32 %v1123_v45, 8  ;;  %vm1148_vm6 = vcmp.lt.s32.totalorder %v3008_v52, 2 }
 0x160   :  { %v76_v37 = vmul.f32 1.442695, %v75_v46  ;;  %v1144_v46 = vshll.u32 %v2152_v1, %v1129_v32  ;;  %v838_v18 = vshrl.u32 %v837_v0, 30  ;;  %v1140_v14 = vor.u32 %v1139_v3, %v1138_v22 }
 0x161   :  { %v974_v20 = vsel %vm891_vm4, %v973_v51, %v972_v40  ;;  %vm3053_vm4 = vcmp.le.f32.partialorder %v776_v54, 0.7853982  ;;  %v766_v54 = vsel %vm755_vm12, nan, %v2998_v41  ;;  %v998_v56 = vstv %s3021_s28 }
 0x162   :  { %2026 = vpow2.f32 %v76_v37  ;;  %v1134_v37 = vor.u32 %v1133_v19, %v1132_v59  ;;  %v839_v23 = vshll.u32 %v838_v18, 30  ;;  %v977_v16 = vsel %vm2947_vm7, %v2435_v26, %v974_v20 }
 0x163   :  { %2028 = vcosq.f32 %v977_v16  ;;  %v1146_v30 = vor.u32 %v1145_v8, %v1144_v46  ;;  %v1000_v24 = vstv %s3023_s29  ;;  %v652_v59 = vsel %vm645_vm15, %v648_v12, %v651_v6 }
 0x164   :  { %v3049_v29 = vsub.s32 %v836_v25, %v839_v23  ;;  %2030 = vsinq.f32 %v977_v16  ;;  %v1155_v61 = vsel %vm1147_vm5, %v1134_v37, %v1137_v9  ;;  %vm985_vm7 = vcmp.eq.s32.totalorder %v3018_v63, 0 }
 0x165   :  { %v862_v25 = vsub.s32 4, %v838_v18  ;;  %v1152_v27 = vsel %vm1150_vm2, %v1140_v14, 2102212464  ;;  %vm984_vm0 = vcmp.lt.s32.totalorder %v3018_v63, 2  ;;  %v1151_v4 = vsel %vm1147_vm5, %v1131_v35, %v1134_v37 }
 0x166   :  { %v842_v13 = vsub.s32 0, %v3049_v29  ;;  %v1159_v41 = vsel %vm1147_vm5, %v1137_v9, %v1140_v14  ;;  %vm981_vm8 = vweird.f32 %v2435_v26  ;;  %v1160_v19 = vsel %vm1150_vm2, %v1146_v30, 1326507024 }
 0x167   :  { %v1153_v3 = vsel %vm1149_vm3, %v1137_v9, %v1152_v27  ;;  %v1161_v40 = vsel %vm1149_vm3, %v1143_v10, %v1160_v19  ;;  %v999_v0 = vmul.f32 %v2854_v57, %v998_v56  ;;  %vm988_vm9 = vcmp.eq.s32.totalorder %v3018_v63, 2 }
 0x168   :  { %v1879_v11 = vmin.u32 %v842_v13, %v3049_v29  ;;  %v863_v12 = vsel %vm778_vm14, %v862_v25, %v838_v18  ;;  %v1162_v6 = vsel %vm1148_vm6, %v1159_v41, %v1161_v40  ;;  %v653_v45 = vsel %vm642_vm1, nan, %v652_v59 }
 0x169   :  { %v832_v46 = vadd.s32 %v2988_v39, %v2976_v17  ;;  %v3112_v51 = vadd.f32 %v1000_v24, %v999_v0  ;;  %v1154_v8 = vsel %vm1148_vm6, %v1151_v4, %v1153_v3  ;;  %v865_v17 = vsel %vm3053_vm4, 0, %v863_v12 }
 0x16a   :  { %v844_v43 = vclz %v1879_v11  ;;  %v3117_v18 = vmul.u32.u64.low %v3044_v33, %v1162_v6  ;;  %v3118_v37 = vmul.u32.u64.high %v3044_v33, %v1162_v6, %v3117_v18  ;;  %v869_v41 = vadd.s32 3, %v865_v17 }
 0x16b   :  { %v1005_v39 = vand.u32 2139095040, %v3112_v51  ;;  %v1337_v3 = vstv %s3128_s30  ;;  %v1339_v12 = vstv %s3134_s4  ;;  %vm1117_vm12 = vcmp.lt.s32.totalorder %v2890_v48, 0 }
 0x16c   :  { %v2027_v60 = vpop.eup %2026  ;;  %v1880_v10 = vadd.s32 4294967294, %v844_v43  ;;  %v3150_v43 = vand.u32 3, %v869_v41  ;;  %vm3183_vm1 = vcmp.le.f32.partialorder %v1115_v38, 0.7853982 }
 0x16d   :  { %v3047_v32 = vmul.f32 %v2027_v60, %v2445_v62  ;;  %v1157_v62 = vsel %vm1149_vm3, %v1140_v14, %v1156_v21  ;;  %v2029_v9 = vpop.eup %2028  ;;  %v1006_v35 = vshrl.u32 %v1005_v39, 23  ;;  %vm868_vm3 = vweird.f32 %v2778_v5 }
 0x16e   :  { %v1158_v31 = vsel %vm1148_vm6, %v1155_v61, %v1157_v62  ;;  %v2031_v14 = vpop.eup %2030  ;;  %v989_v20 = vxor.u32 2147483648, %v2029_v9  ;;  %vm1881_vm11 = vcmp.lt.s32.totalorder %v1880_v10, 0  ;;  %vm871_vm6 = vcmp.lt.s32.totalorder %v3150_v43, 2 }
 0x16f   :  { %79 = vadd.xlane.f32.xlu0 %v3047_v32  ;;  %v89_v36 = vmul.f32 %v2612_v28, %v3047_v32  ;;  %v202_v28 = vmul.f32 %v2883_v2, %v3047_v32  ;;  %v3090_v2 = vmul.u32.u64.low %v3044_v33, %v1158_v31  ;;  %v3091_v44 = vmul.u32.u64.high %v3044_v33, %v1158_v31, %v3090_v2 }
 0x170   :  { %v315_v22 = vmul.f32 %v2888_v50, %v3047_v32  ;;  %v541_v50 = vmul.f32 %v2894_v34, %v3047_v32  ;;  %v428_v34 = vmul.f32 %v2899_v15, %v3047_v32  ;;  %v767_v42 = vmul.f32 %v766_v54, %v3047_v32 }
 0x171   :  { %90 = vadd.xlane.f32.xlu1 %v89_v36  ;;  %v654_v52 = vmul.f32 %v653_v45, %v3047_v32  ;;  %v1173_v23 = vadd.s32 1, %v3091_v44  ;;  %v986_v60 = vxor.u32 2147483648, %v2031_v14  ;;  %v847_v16 = vsel %vm1881_vm11, 0, %v1880_v10 }
 0x172   :  { %v1170_v15 = vmul.u32 %v3044_v33, %v1154_v8  ;;  %v990_v21 = vsel %vm988_vm9, %v989_v20, %v2031_v14  ;;  %v848_v30 = vsub.s32 32, %v847_v16  ;;  %v849_v61 = vshll.u32 %v3049_v29, %v847_v16 }
 0x173   :  { %203 = vadd.xlane.f32.xlu0 %v202_v28  ;;  %v852_v62 = vsub.s32 4294967266, %v847_v16  ;;  %v987_v36 = vsel %vm985_vm7, %v2029_v9, %v986_v60  ;;  %vm1172_vm13 = vc.u32 %v3118_v37, %v3090_v2  ;;  %v1002_v54 = vand.u32 2147483647, %v3112_v51 }
 0x174   :  { %v1890_v33 = vadd.s32 4294967169, %v1006_v35  ;;  %v991_v56 = vsel %vm984_vm0, %v987_v36, %v990_v21  ;;  %v850_v24 = vshrl.u32 %v832_v46, %v848_v30  ;;  %v1174_v29 = vsel %vm1172_vm13, %v1173_v23, %v3091_v44 }
 0x175   :  { %316 = vadd.xlane.f32.xlu1 %v315_v22  ;;  %v853_v59 = vadd.s32 127, %v852_v62  ;;  %v992_v13 = vsel %vm981_vm8, nan, %v991_v56  ;;  %v1175_v25 = vadd.s32 %v1174_v29, %v1170_v15  ;;  %v1009_v63 = vand.u32 8388607, %v1002_v54 }
 0x176   :  { %v1012_v27 = vadd.s32 1, %v1890_v33  ;;  %v993_v28 = vmul.f32 %v992_v13, %v3047_v32  ;;  %v851_v4 = vor.u32 %v850_v24, %v849_v61  ;;  %v1338_v46 = vmul.f32 %v2854_v57, %v1337_v3 }
 0x177   :  { %542 = vadd.xlane.f32.xlu0 %v541_v50  ;;  %v854_v31 = vshll.u32 %v853_v59, 23  ;;  %v1176_v11 = vadd.s32 536870912, %v1175_v25  ;;  %v1010_v50 = vor.u32 8388608, %v1009_v63  ;;  %v1171_v8 = vadd.s32 %v3090_v2, %v3118_v37 }
 0x178   :  { %vm1013_vm10 = vcmp.gt.s32.totalorder %v1012_v27, 0  ;;  %v858_v44 = vcvt.s32.f32 %v851_v4  ;;  %v3170_v16 = vadd.f32 %v1339_v12, %v1338_v46  ;;  %vm872_vm7 = vcmp.eq.s32.totalorder %v3150_v43, 0 }
 0x179   :  { %429 = vadd.xlane.f32.xlu1 %v428_v34  ;;  %v855_v19 = vor.u32 4788187, %v854_v31  ;;  %v1014_v22 = vsel %vm1013_vm10, %v1012_v27, 0  ;;  %v1177_v26 = vshrl.u32 %v1176_v11, 30  ;;  %v3168_v60 = vshll.u32 %v1010_v50, 8 }
 0x17a   :  { %v1016_v40 = vand.u32 31, %v1014_v22  ;;  %v1015_v18 = vshrl.u32 %v1014_v22, 5  ;;  %v1344_v47 = vand.u32 2139095040, %v3170_v16  ;;  %vm875_vm0 = vcmp.eq.s32.totalorder %v3150_v43, 2 }
 0x17b   :  { %768 = vadd.xlane.f32.xlu0 %v767_v42  ;;  %v856_v0 = vand.u32 2147483647, %v855_v19  ;;  %v1178_v6 = vshll.u32 %v1177_v26, 30  ;;  %v1201_v13 = vsub.s32 4, %v1177_v26  ;;  %vm1004_vm11 = vcmp.lt.s32.totalorder %v3112_v51, 0 }
 0x17c   :  { %v1017_v45 = vsub.s32 32, %v1016_v40  ;;  %v1019_v9 = vshll.u32 %v2149_v53, %v1016_v40  ;;  %v1022_v17 = vshll.u32 %v2150_v55, %v1016_v40  ;;  %v1025_v39 = vshll.u32 %v2151_v58, %v1016_v40 }
 0x17d   :  { %655 = vadd.xlane.f32.xlu1 %v654_v52  ;;  %v859_v10 = vmul.f32 %v858_v44, %v856_v0  ;;  %v3157_v34 = vsub.s32 %v1175_v25, %v1178_v6  ;;  %v1028_v2 = vshll.u32 %v2148_v49, %v1016_v40  ;;  %v1031_v30 = vshll.u32 %v2152_v1, %v1016_v40 }
 0x17e   :  { %v1020_v42 = vshrl.u32 %v2150_v55, %v1017_v45  ;;  %v1023_v52 = vshrl.u32 %v2151_v58, %v1017_v45  ;;  %v1026_v20 = vshrl.u32 %v2148_v49, %v1017_v45  ;;  %v1029_v23 = vshrl.u32 %v2152_v1, %v1017_v45 }
 0x17f   :  { %994 = vadd.xlane.f32.xlu0 %v993_v28  ;;  %v860_v14 = vxor.u32 2147483648, %v859_v10  ;;  %v1181_v37 = vsub.s32 0, %v3157_v34  ;;  %v1018_v35 = vshrl.u32 %v2149_v53, %v1017_v45  ;;  %v1032_v24 = vshrl.u32 %v2153_v7, %v1017_v45 }
 0x180   :  { %v1021_v21 = vor.u32 %v1020_v42, %v1019_v9  ;;  %v1024_v36 = vor.u32 %v1023_v52, %v1022_v17  ;;  %v1027_v33 = vor.u32 %v1026_v20, %v1025_v39  ;;  %v1030_v56 = vor.u32 %v1029_v23, %v1028_v2 }
 0x181   :  { %v861_v15 = vsel %vm778_vm14, %v860_v14, %v859_v10  ;;  %v1897_v62 = vmin.u32 %v1181_v37, %v3157_v34  ;;  %vm1034_vm15 = vcmp.lt.s32.totalorder %v1015_v18, 1  ;;  %v1033_v25 = vor.u32 %v1032_v24, %v1031_v30 }
 0x182   :  { %v864_v61 = vsel %vm3053_vm4, %v2778_v5, %v861_v15  ;;  %vm1035_vm2 = vcmp.lt.s32.totalorder %v1015_v18, 2  ;;  %vm1036_vm14 = vcmp.lt.s32.totalorder %v1015_v18, 3  ;;  %vm1037_vm5 = vcmp.lt.s32.totalorder %v1015_v18, 4 }
 0x183   :  { %2032 = vcosq.f32 %v864_v61  ;;  %v1183_v29 = vclz %v1897_v62  ;;  %v1038_v28 = vsel %vm1034_vm15, %v1018_v35, %v1021_v21  ;;  %v1039_v4 = vsel %vm1037_vm5, %v1027_v33, 2102212464 }
 0x184   :  { %2034 = vsinq.f32 %v864_v61  ;;  %v1042_v31 = vsel %vm1034_vm15, %v1021_v21, %v1024_v36  ;;  %v1040_v41 = vsel %vm1036_vm14, %v1024_v36, %v1039_v4  ;;  %v1043_v11 = vsel %vm1037_vm5, %v1030_v56, 920167782 }
 0x185   :  { %v1898_v27 = vadd.s32 4294967294, %v1183_v29  ;;  %v1046_v38 = vsel %vm1034_vm15, %v1024_v36, %v1027_v33  ;;  %v1047_v63 = vsel %vm1037_vm5, %v1033_v25, 1326507024  ;;  %v1202_v19 = vsel %vm1117_vm12, %v1201_v13, %v1177_v26 }
 0x186   :  { %v1044_v44 = vsel %vm1036_vm14, %v1027_v33, %v1043_v11  ;;  %v1048_v22 = vsel %vm1036_vm14, %v1030_v56, %v1047_v63  ;;  %v1041_v40 = vsel %vm1035_vm2, %v1038_v28, %v1040_v41  ;;  %v1345_v46 = vshrl.u32 %v1344_v47, 23 }
 0x187   :  { %vm1899_vm4 = vcmp.lt.s32.totalorder %v1898_v27, 0  ;;  %v1045_v0 = vsel %vm1035_vm2, %v1042_v31, %v1044_v44  ;;  %v1049_v12 = vsel %vm1035_vm2, %v1046_v38, %v1048_v22  ;;  %v1341_v52 = vand.u32 2147483647, %v3170_v16 }
 0x188   :  { %v1186_v3 = vsel %vm1899_vm4, 0, %v1898_v27  ;;  %v3201_v10 = vmul.u32.u64.low %v3168_v60, %v1049_v12  ;;  %v3202_v9 = vmul.u32.u64.high %v3168_v60, %v1049_v12, %v3201_v10  ;;  %v1908_v18 = vadd.s32 4294967169, %v1345_v46 }
 0x189   :  { %v1187_v6 = vsub.s32 32, %v1186_v3  ;;  %v1188_v50 = vshll.u32 %v3157_v34, %v1186_v3  ;;  %v1191_v45 = vsub.s32 4294967266, %v1186_v3  ;;  %v1204_v34 = vsel %vm3183_vm1, 0, %v1202_v19 }
 0x18a   :  { %v3205_v26 = vmul.u32.u64.low %v3168_v60, %v1045_v0  ;;  %v3206_v42 = vmul.u32.u64.high %v3168_v60, %v1045_v0, %v3205_v26  ;;  %v1224_v21 = vstv %s3191_s5  ;;  %v1351_v36 = vadd.s32 1, %v1908_v18 }
 0x18b   :  { %v1189_v17 = vshrl.u32 %v1171_v8, %v1187_v6  ;;  %v1192_v39 = vadd.s32 127, %v1191_v45  ;;  %v1057_v8 = vmul.u32 %v3168_v60, %v1041_v40  ;;  %v1208_v56 = vadd.s32 3, %v1204_v34 }
 0x18c   :  { %vm1059_vm8 = vc.u32 %v3202_v9, %v3205_v26  ;;  %v1060_v35 = vadd.s32 1, %v3206_v42  ;;  %v1348_v60 = vand.u32 8388607, %v1341_v52  ;;  %vm1352_vm9 = vcmp.gt.s32.totalorder %v1351_v36, 0 }
 0x18d   :  { %v2033_v14 = vpop.eup %2032  ;;  %v1190_v37 = vor.u32 %v1189_v17, %v1188_v50  ;;  %v1193_v23 = vshll.u32 %v1192_v39, 23  ;;  %v1353_v27 = vsel %vm1352_vm9, %v1351_v36, 0  ;;  %v1225_v28 = vmul.f32 %v2854_v57, %v1224_v21 }
 0x18e   :  { %v2035_v20 = vpop.eup %2034  ;;  %v876_v2 = vxor.u32 2147483648, %v2033_v14  ;;  %v1061_v24 = vsel %vm1059_vm8, %v1060_v35, %v3206_v42  ;;  %v1226_v11 = vstv %s3209_s0  ;;  %v1355_v38 = vand.u32 31, %v1353_v27 }
 0x18f   :  { %v873_v15 = vxor.u32 2147483648, %v2035_v20  ;;  %v1194_v61 = vor.u32 4788187, %v1193_v23  ;;  %v1197_v62 = vcvt.s32.f32 %v1190_v37  ;;  %v1062_v47 = vadd.s32 %v1061_v24, %v1057_v8 }
 0x190   :  { %v877_v30 = vsel %vm875_vm0, %v876_v2, %v2035_v20  ;;  %v3232_v19 = vand.u32 3, %v1208_v56  ;;  %v1349_v44 = vor.u32 8388608, %v1348_v60  ;;  %v3235_v22 = vadd.s32 %v3205_v26, %v3202_v9 }
 0x191   :  { %v874_v33 = vsel %vm872_vm7, %v2033_v14, %v873_v15  ;;  %v1195_v13 = vand.u32 2147483647, %v1194_v61  ;;  %v1063_v41 = vadd.s32 536870912, %v1062_v47  ;;  %v1356_v5 = vsub.s32 32, %v1355_v38 }
 0x192   :  { %v878_v29 = vsel %vm871_vm6, %v874_v33, %v877_v30  ;;  %v1358_v3 = vshll.u32 %v2149_v53, %v1355_v38  ;;  %v3238_v40 = vadd.f32 %v1226_v11, %v1225_v28  ;;  %v1361_v12 = vshll.u32 %v2150_v55, %v1355_v38 }
 0x193   :  { %v879_v25 = vsel %vm868_vm3, nan, %v878_v29  ;;  %v1198_v31 = vmul.f32 %v1197_v62, %v1195_v13  ;;  %v1064_v43 = vshrl.u32 %v1063_v41, 30  ;;  %v1364_v6 = vshll.u32 %v2151_v58, %v1355_v38 }
 0x194   :  { %v880_v4 = vmul.f32 %v879_v25, %v3047_v32  ;;  %v1354_v45 = vshrl.u32 %v1353_v27, 5  ;;  %v1359_v46 = vshrl.u32 %v2150_v55, %v1356_v5  ;;  %v1362_v10 = vshrl.u32 %v2151_v58, %v1356_v5 }
 0x195   :  { %v1199_v63 = vxor.u32 2147483648, %v1198_v31  ;;  %v1065_v0 = vshll.u32 %v1064_v43, 30  ;;  %v1365_v26 = vshrl.u32 %v2148_v49, %v1356_v5  ;;  %v1367_v42 = vshll.u32 %v2148_v49, %v1355_v38 }
 0x196   :  { %881 = vadd.xlane.f32.xlu1 %v880_v4  ;;  %v1357_v17 = vshrl.u32 %v2149_v53, %v1356_v5  ;;  %v1360_v39 = vor.u32 %v1359_v46, %v1358_v3  ;;  %v3255_v59 = vshll.u32 %v1349_v44, 8  ;;  %vm1214_vm13 = vcmp.eq.s32.totalorder %v3232_v19, 2 }
 0x197   :  { %v1200_v57 = vsel %vm1117_vm12, %v1199_v63, %v1198_v31  ;;  %v3250_v9 = vsub.s32 %v1062_v47, %v1065_v0  ;;  %v1363_v14 = vor.u32 %v1362_v10, %v1361_v12  ;;  %v1366_v34 = vor.u32 %v1365_v26, %v1364_v6 }
 0x198   :  { %v1203_v50 = vsel %vm3183_vm1, %v2890_v48, %v1200_v57  ;;  %v1368_v20 = vshrl.u32 %v2152_v1, %v1356_v5  ;;  %vm1211_vm10 = vcmp.eq.s32.totalorder %v3232_v19, 0  ;;  %v1370_v2 = vshll.u32 %v2152_v1, %v1355_v38 }
 0x199   :  { %2036 = vcosq.f32 %v1203_v50  ;;  %v1068_v18 = vsub.s32 0, %v3250_v9  ;;  %v1371_v37 = vshrl.u32 %v2153_v7, %v1356_v5  ;;  %vm1373_vm12 = vcmp.lt.s32.totalorder %v1354_v45, 1 }
 0x19a   :  { %2038 = vsinq.f32 %v1203_v50  ;;  %v1231_v23 = vand.u32 2139095040, %v3238_v40  ;;  %vm1210_vm15 = vcmp.lt.s32.totalorder %v3232_v19, 2  ;;  %vm3267_vm1 = vcmp.le.f32.partialorder %v1002_v54, 0.7853982 }
 0x19b   :  { %v1891_v15 = vmin.u32 %v1068_v18, %v3250_v9  ;;  %v1369_v35 = vor.u32 %v1368_v20, %v1367_v42  ;;  %vm1374_vm2 = vcmp.lt.s32.totalorder %v1354_v45, 2  ;;  %vm1376_vm14 = vcmp.lt.s32.totalorder %v1354_v45, 4 }
 0x19c   :  { %vm1207_vm5 = vweird.f32 %v2890_v48  ;;  %v1088_v21 = vsub.s32 4, %v1064_v43  ;;  %v1372_v30 = vor.u32 %v1371_v37, %v1370_v2  ;;  %vm1375_vm3 = vcmp.lt.s32.totalorder %v1354_v45, 3 }
 0x19d   :  { %v1378_v61 = vsel %vm1376_vm14, %v1366_v34, 2102212464  ;;  %v1070_v62 = vclz %v1891_v15  ;;  %v1377_v36 = vsel %vm1373_vm12, %v1357_v17, %v1360_v39  ;;  %v1381_v33 = vsel %vm1373_vm12, %v1360_v39, %v1363_v14 }
 0x19e   :  { %v1385_v54 = vsel %vm1373_vm12, %v1363_v14, %v1366_v34  ;;  %v1379_v56 = vsel %vm1375_vm3, %v1363_v14, %v1378_v61  ;;  %v1382_v24 = vsel %vm1376_vm14, %v1369_v35, 920167782  ;;  %v1386_v60 = vsel %vm1376_vm14, %v1372_v30, 1326507024 }
 0x19f   :  { %v1232_v29 = vshrl.u32 %v1231_v23, 23  ;;  %v1892_v13 = vadd.s32 4294967294, %v1070_v62  ;;  %v1383_v47 = vsel %vm1375_vm3, %v1366_v34, %v1382_v24  ;;  %v1387_v25 = vsel %vm1375_vm3, %v1369_v35, %v1386_v60 }
 0x1a0   :  { %v1228_v27 = vand.u32 2147483647, %v3238_v40  ;;  %v1089_v28 = vsel %vm1004_vm11, %v1088_v21, %v1064_v43  ;;  %v1384_v4 = vsel %vm1374_vm2, %v1381_v33, %v1383_v47  ;;  %v1388_v31 = vsel %vm1374_vm2, %v1385_v54, %v1387_v25 }
 0x1a1   :  { %v1902_v41 = vadd.s32 4294967169, %v1232_v29  ;;  %vm1893_vm4 = vcmp.lt.s32.totalorder %v1892_v13, 0  ;;  %v1380_v38 = vsel %vm1374_vm2, %v1377_v36, %v1379_v56  ;;  %v1091_v10 = vsel %vm3267_vm1, 0, %v1089_v28 }
 0x1a2   :  { %v3283_v63 = vmul.u32.u64.low %v3255_v59, %v1388_v31  ;;  %v3284_v44 = vmul.u32.u64.high %v3255_v59, %v1388_v31, %v3283_v63  ;;  %v1073_v57 = vsel %vm1893_vm4, 0, %v1892_v13  ;;  %v1235_v26 = vand.u32 8388607, %v1228_v27 }
 0x1a3   :  { %v2037_v11 = vpop.eup %2036  ;;  %v3287_v0 = vmul.u32.u64.low %v3255_v59, %v1384_v4  ;;  %v3288_v12 = vmul.u32.u64.high %v3255_v59, %v1384_v4, %v3287_v0  ;;  %v1074_v6 = vsub.s32 32, %v1073_v57  ;;  %v1075_v50 = vshll.u32 %v3250_v9, %v1073_v57 }
 0x1a4   :  { %v2039_v5 = vpop.eup %2038  ;;  %v1215_v3 = vxor.u32 2147483648, %v2037_v11  ;;  %v1078_v46 = vsub.s32 4294967266, %v1073_v57  ;;  %v1238_v42 = vadd.s32 1, %v1902_v41  ;;  %v1396_v14 = vmul.u32 %v3255_v59, %v1380_v38 }
 0x1a5   :  { %v1212_v43 = vxor.u32 2147483648, %v2039_v5  ;;  %v1076_v39 = vshrl.u32 %v3235_v22, %v1074_v6  ;;  %vm1398_vm6 = vc.u32 %v3284_v44, %v3287_v0  ;;  %v1399_v34 = vadd.s32 1, %v3288_v12 }
 0x1a6   :  { %v1216_v45 = vsel %vm1214_vm13, %v1215_v3, %v2039_v5  ;;  %v1079_v18 = vadd.s32 127, %v1078_v46  ;;  %vm1239_vm7 = vcmp.gt.s32.totalorder %v1238_v42, 0  ;;  %v1095_v19 = vadd.s32 3, %v1091_v10 }
 0x1a7   :  { %v1213_v17 = vsel %vm1211_vm10, %v2037_v11, %v1212_v43  ;;  %v1077_v22 = vor.u32 %v1076_v39, %v1075_v50  ;;  %v1240_v37 = vsel %vm1239_vm7, %v1238_v42, 0  ;;  %v1400_v23 = vsel %vm1398_vm6, %v1399_v34, %v3288_v12 }
 0x1a8   :  { %v1217_v9 = vsel %vm1210_vm15, %v1213_v17, %v1216_v45  ;;  %v1080_v2 = vshll.u32 %v1079_v18, 23  ;;  %v1242_v15 = vand.u32 31, %v1240_v37  ;;  %v1401_v30 = vadd.s32 %v1400_v23, %v1396_v14  ;;  %v3339_v17 = vld [vmem:[#allocation8] sm:$0xff] }
 0x1a9   :  { %v1218_v20 = vsel %vm1207_vm5, nan, %v1217_v9  ;;  %v1084_v21 = vcvt.s32.f32 %v1077_v22  ;;  %v1236_v61 = vor.u32 8388608, %v1235_v26  ;;  %v1241_v62 = vshrl.u32 %v1240_v37, 5 }
 0x1aa   :  { %v1219_v59 = vmul.f32 %v1218_v20, %v3047_v32  ;;  %v1081_v35 = vor.u32 4788187, %v1080_v2  ;;  %v1243_v36 = vsub.s32 32, %v1242_v15  ;;  %v1245_v33 = vshll.u32 %v2149_v53, %v1242_v15 }
 0x1ab   :  { %v1248_v48 = vshll.u32 %v2150_v55, %v1242_v15  ;;  %v1402_v56 = vadd.s32 536870912, %v1401_v30  ;;  %v1251_v24 = vshll.u32 %v2151_v58, %v1242_v15  ;;  %v1254_v60 = vshll.u32 %v2148_v49, %v1242_v15 }
 0x1ac   :  { %1220 = vadd.xlane.f32.xlu0 %v1219_v59  ;;  %v1082_v54 = vand.u32 2147483647, %v1081_v35  ;;  %v1246_v29 = vshrl.u32 %v2150_v55, %v1243_v36  ;;  %v1249_v13 = vshrl.u32 %v2151_v58, %v1243_v36  ;;  %v1252_v47 = vshrl.u32 %v2148_v49, %v1243_v36 }
 0x1ad   :  { %v1257_v25 = vshll.u32 %v2152_v1, %v1242_v15  ;;  %v1403_v4 = vshrl.u32 %v1402_v56, 30  ;;  %v1255_v31 = vshrl.u32 %v2152_v1, %v1243_v36  ;;  %v1258_v41 = vshrl.u32 %v2153_v7, %v1243_v36 }
 0x1ae   :  { %v1085_v28 = vmul.f32 %v1084_v21, %v1082_v54  ;;  %v3325_v11 = vand.u32 3, %v1095_v19  ;;  %v3327_v38 = vshll.u32 %v1236_v61, 8  ;;  %v1563_v63 = vstv %s3307_s6 }
 0x1af   :  { %v1565_v5 = vstv %s3309_s7  ;;  %v1404_v57 = vshll.u32 %v1403_v4, 30  ;;  %v1247_v12 = vor.u32 %v1246_v29, %v1245_v33  ;;  %v1250_v43 = vor.u32 %v1249_v13, %v1248_v48 }
 0x1b0   :  { %v1086_v3 = vxor.u32 2147483648, %v1085_v28  ;;  %v1244_v6 = vshrl.u32 %v2149_v53, %v1243_v36  ;;  %v1253_v50 = vor.u32 %v1252_v47, %v1251_v24  ;;  %v1256_v46 = vor.u32 %v1255_v31, %v1254_v60 }
 0x1b1   :  { %vm1260_vm0 = vcmp.lt.s32.totalorder %v1241_v62, 1  ;;  %v3334_v10 = vsub.s32 %v1401_v30, %v1404_v57  ;;  %v1259_v26 = vor.u32 %v1258_v41, %v1257_v25  ;;  %vm1263_vm8 = vcmp.lt.s32.totalorder %v1241_v62, 4 }
 0x1b2   :  { %v1087_v45 = vsel %vm1004_vm11, %v1086_v3, %v1085_v28  ;;  %vm1261_vm9 = vcmp.lt.s32.totalorder %v1241_v62, 2  ;;  %vm1262_vm13 = vcmp.lt.s32.totalorder %v1241_v62, 3  ;;  %v1564_v39 = vmul.f32 %v3339_v17, %v1563_v63 }
 0x1b3   :  { %v1090_v42 = vsel %vm3267_vm1, %v3112_v51, %v1087_v45  ;;  %v1407_v18 = vsub.s32 0, %v3334_v10  ;;  %v1265_v14 = vsel %vm1263_vm8, %v1253_v50, 2102212464  ;;  %v1268_v9 = vsel %vm1260_vm0, %v1247_v12, %v1250_v43 }
 0x1b4   :  { %2040 = vcosq.f32 %v1090_v42  ;;  %v1427_v34 = vsub.s32 4, %v1403_v4  ;;  %v1264_v20 = vsel %vm1260_vm0, %v1244_v6, %v1247_v12  ;;  %v1269_v8 = vsel %vm1263_vm8, %v1256_v46, 920167782 }
 0x1b5   :  { %2042 = vsinq.f32 %v1090_v42  ;;  %v1909_v22 = vmin.u32 %v1407_v18, %v3334_v10  ;;  %v1270_v2 = vsel %vm1262_vm13, %v1253_v50, %v1269_v8  ;;  %v1272_v37 = vsel %vm1260_vm0, %v1250_v43, %v1253_v50 }
 0x1b6   :  { %v1273_v59 = vsel %vm1263_vm8, %v1259_v26, 1326507024  ;;  %v1266_v19 = vsel %vm1262_vm13, %v1250_v43, %v1265_v14  ;;  %v1271_v23 = vsel %vm1261_vm9, %v1268_v9, %v1270_v2  ;;  %v3354_v35 = vadd.f32 %v1565_v5, %v1564_v39 }
 0x1b7   :  { %v1274_v15 = vsel %vm1262_vm13, %v1256_v46, %v1273_v59  ;;  %vm1343_vm11 = vcmp.lt.s32.totalorder %v3170_v16, 0  ;;  %v1409_v21 = vclz %v1909_v22  ;;  %v1267_v54 = vsel %vm1261_vm9, %v1264_v20, %v1266_v19 }
 0x1b8   :  { %v1428_v30 = vsel %vm1343_vm11, %v1427_v34, %v1403_v4  ;;  %v1275_v61 = vsel %vm1261_vm9, %v1272_v37, %v1274_v15  ;;  %v3361_v36 = vmul.u32.u64.low %v3327_v38, %v1271_v23  ;;  %v3362_v33 = vmul.u32.u64.high %v3327_v38, %v1271_v23, %v3361_v36 }
 0x1b9   :  { %v1910_v48 = vadd.s32 4294967294, %v1409_v21  ;;  %v3367_v56 = vmul.u32.u64.low %v3327_v38, %v1275_v61  ;;  %v3368_v24 = vmul.u32.u64.high %v3327_v38, %v1275_v61, %v3367_v56  ;;  %vm1094_vm10 = vweird.f32 %v3112_v51 }
 0x1ba   :  { %vm1097_vm12 = vcmp.lt.s32.totalorder %v3325_v11, 2  ;;  %vm3374_vm15 = vcmp.le.f32.partialorder %v1341_v52, 0.7853982  ;;  %v1570_v29 = vand.u32 2139095040, %v3354_v35  ;;  %vm1101_vm1 = vcmp.eq.s32.totalorder %v3325_v11, 2 }
 0x1bb   :  { %v1397_v62 = vadd.s32 %v3287_v0, %v3284_v44  ;;  %vm1911_vm2 = vcmp.lt.s32.totalorder %v1910_v48, 0  ;;  %v1430_v13 = vsel %vm3374_vm15, 0, %v1428_v30  ;;  %v1283_v25 = vmul.u32 %v3327_v38, %v1267_v54 }
 0x1bc   :  { %v1412_v47 = vsel %vm1911_vm2, 0, %v1910_v48  ;;  %v1286_v52 = vadd.s32 1, %v3362_v33  ;;  %v1571_v28 = vshrl.u32 %v1570_v29, 23  ;;  %v1567_v5 = vand.u32 2147483647, %v3354_v35 }
 0x1bd   :  { %v1413_v31 = vsub.s32 32, %v1412_v47  ;;  %v1414_v41 = vshll.u32 %v3334_v10, %v1412_v47  ;;  %v1417_v63 = vsub.s32 4294967266, %v1412_v47  ;;  %vm1098_vm14 = vcmp.eq.s32.totalorder %v3325_v11, 0 }
 0x1be   :  { %v2041_v4 = vpop.eup %2040  ;;  %vm1285_vm5 = vc.u32 %v3368_v24, %v3361_v36  ;;  %v1920_v0 = vadd.s32 4294967169, %v1571_v28  ;;  %v1434_v50 = vadd.s32 3, %v1430_v13  ;;  %v1574_v39 = vand.u32 8388607, %v1567_v5 }
 0x1bf   :  { %v2043_v3 = vpop.eup %2042  ;;  %v1102_v44 = vxor.u32 2147483648, %v2041_v4  ;;  %v1415_v57 = vshrl.u32 %v1397_v62, %v1413_v31  ;;  %v1418_v12 = vadd.s32 127, %v1417_v63  ;;  %v1287_v43 = vsel %vm1285_vm5, %v1286_v52, %v3362_v33 }
 0x1c0   :  { %v1099_v38 = vxor.u32 2147483648, %v2043_v3  ;;  %v1288_v46 = vadd.s32 %v1287_v43, %v1283_v25  ;;  %v1577_v45 = vadd.s32 1, %v1920_v0  ;;  %v1450_v9 = vstv %s3379_s8 }
 0x1c1   :  { %v1103_v6 = vsel %vm1101_vm1, %v1102_v44, %v2043_v3  ;;  %v1416_v26 = vor.u32 %v1415_v57, %v1414_v41  ;;  %v1419_v42 = vshll.u32 %v1418_v12, 23  ;;  %v3408_v23 = vand.u32 3, %v1434_v50 }
 0x1c2   :  { %v1100_v10 = vsel %vm1098_vm14, %v2041_v4, %v1099_v38  ;;  %v1289_v14 = vadd.s32 536870912, %v1288_v46  ;;  %vm1578_vm3 = vcmp.gt.s32.totalorder %v1577_v45, 0  ;;  %v1451_v21 = vmul.f32 %v3339_v17, %v1450_v9 }
 0x1c3   :  { %v1104_v18 = vsel %vm1097_vm12, %v1100_v10, %v1103_v6  ;;  %v1420_v20 = vor.u32 4788187, %v1419_v42  ;;  %v1423_v8 = vcvt.s32.f32 %v1416_v26  ;;  %v1579_v22 = vsel %vm1578_vm3, %v1577_v45, 0 }
 0x1c4   :  { %v1105_v34 = vsel %vm1094_vm10, nan, %v1104_v18  ;;  %v3406_v37 = vshrl.u32 %v1289_v14, 30  ;;  %v1581_v59 = vand.u32 31, %v1579_v22  ;;  %v1452_v30 = vstv %s3393_s9 }
 0x1c5   :  { %v1106_v2 = vmul.f32 %v1105_v34, %v3047_v32  ;;  %v1421_v19 = vand.u32 2147483647, %v1420_v20  ;;  %v1575_v61 = vor.u32 8388608, %v1574_v39  ;;  %v1580_v33 = vshrl.u32 %v1579_v22, 5 }
 0x1c6   :  { %v1291_v11 = vshll.u32 %v3406_v37, 30  ;;  %v1582_v15 = vsub.s32 32, %v1581_v59  ;;  %v1584_v48 = vshll.u32 %v2149_v53, %v1581_v59  ;;  %v1587_v29 = vshll.u32 %v2150_v55, %v1581_v59 }
 0x1c7   :  { %1107 = vadd.xlane.f32.xlu1 %v1106_v2  ;;  %v1424_v51 = vmul.f32 %v1423_v8, %v1421_v19  ;;  %v1590_v62 = vshll.u32 %v2151_v58, %v1581_v59  ;;  %v1593_v52 = vshll.u32 %v2148_v49, %v1581_v59  ;;  %v1284_v28 = vadd.s32 %v3361_v36, %v3368_v24 }
 0x1c8   :  { %v3414_v54 = vsub.s32 %v1288_v46, %v1291_v11  ;;  %v1585_v56 = vshrl.u32 %v2150_v55, %v1582_v15  ;;  %v1588_v47 = vshrl.u32 %v2151_v58, %v1582_v15  ;;  %v1591_v25 = vshrl.u32 %v2148_v49, %v1582_v15 }
 0x1c9   :  { %v1425_v13 = vxor.u32 2147483648, %v1424_v51  ;;  %v1594_v31 = vshrl.u32 %v2152_v1, %v1582_v15  ;;  %v3426_v41 = vadd.f32 %v1452_v30, %v1451_v21  ;;  %v1583_v3 = vshrl.u32 %v2149_v53, %v1582_v15 }
 0x1ca   :  { %v1294_v4 = vsub.s32 0, %v3414_v54  ;;  %v1586_v44 = vor.u32 %v1585_v56, %v1584_v48  ;;  %v1596_v0 = vshll.u32 %v2152_v1, %v1581_v59  ;;  %v1589_v24 = vor.u32 %v1588_v47, %v1587_v29 }
 0x1cb   :  { %v1426_v63 = vsel %vm1343_vm11, %v1425_v13, %v1424_v51  ;;  %v1592_v57 = vor.u32 %v1591_v25, %v1590_v62  ;;  %vm1230_vm4 = vcmp.lt.s32.totalorder %v3238_v40, 0  ;;  %v1595_v12 = vor.u32 %v1594_v31, %v1593_v52 }
 0x1cc   :  { %v1429_v38 = vsel %vm3374_vm15, %v3170_v16, %v1426_v63  ;;  %v1903_v36 = vmin.u32 %v1294_v4, %v3414_v54  ;;  %v1597_v43 = vshrl.u32 %v2153_v7, %v1582_v15  ;;  %vm1599_vm6 = vcmp.lt.s32.totalorder %v1580_v33, 1 }
 0x1cd   :  { %2044 = vcosq.f32 %v1429_v38  ;;  %v1615_v50 = vshll.u32 %v1575_v61, 8  ;;  %v1457_v46 = vand.u32 2139095040, %v3426_v41  ;;  %vm1600_vm7 = vcmp.lt.s32.totalorder %v1580_v33, 2 }
 0x1ce   :  { %2046 = vsinq.f32 %v1429_v38  ;;  %v1296_v6 = vclz %v1903_v36  ;;  %v1598_v45 = vor.u32 %v1597_v43, %v1596_v0  ;;  %vm1601_vm0 = vcmp.lt.s32.totalorder %v1580_v33, 3 }
 0x1cf   :  { %vm1602_vm8 = vcmp.lt.s32.totalorder %v1580_v33, 4  ;;  %vm3441_vm9 = vcmp.le.f32.partialorder %v1228_v27, 0.7853982  ;;  %v1603_v26 = vsel %vm1599_vm6, %v1583_v3, %v1586_v44  ;;  %v1607_v39 = vsel %vm1599_vm6, %v1586_v44, %v1589_v24 }
 0x1d0   :  { %v1904_v10 = vadd.s32 4294967294, %v1296_v6  ;;  %v1604_v42 = vsel %vm1602_vm8, %v1592_v57, 2102212464  ;;  %v1608_v14 = vsel %vm1602_vm8, %v1595_v12, 920167782  ;;  %v1611_v9 = vsel %vm1599_vm6, %v1589_v24, %v1592_v57 }
 0x1d1   :  { %v1605_v18 = vsel %vm1601_vm0, %v1589_v24, %v1604_v42  ;;  %v1612_v34 = vsel %vm1602_vm8, %v1598_v45, 1326507024  ;;  %v1314_v20 = vsub.s32 4, %v3406_v37  ;;  %v1609_v8 = vsel %vm1601_vm0, %v1592_v57, %v1608_v14 }
 0x1d2   :  { %vm1905_vm13 = vcmp.lt.s32.totalorder %v1904_v10, 0  ;;  %v1613_v22 = vsel %vm1601_vm0, %v1595_v12, %v1612_v34  ;;  %vm1436_vm11 = vcmp.lt.s32.totalorder %v3408_v23, 2  ;;  %v1610_v2 = vsel %vm1600_vm7, %v1607_v39, %v1609_v8 }
 0x1d3   :  { %v1299_v27 = vsel %vm1905_vm13, 0, %v1904_v10  ;;  %v1614_v59 = vsel %vm1600_vm7, %v1611_v9, %v1613_v22  ;;  %v1606_v21 = vsel %vm1600_vm7, %v1603_v26, %v1605_v18  ;;  %v1315_v62 = vsel %vm1230_vm4, %v1314_v20, %v3406_v37 }
 0x1d4   :  { %v1300_v19 = vsub.s32 32, %v1299_v27  ;;  %v1301_v11 = vshll.u32 %v3414_v54, %v1299_v27  ;;  %v1304_v15 = vsub.s32 4294967266, %v1299_v27  ;;  %v1458_v13 = vshrl.u32 %v1457_v46, 23 }
 0x1d5   :  { %v3454_v30 = vmul.u32.u64.low %v1615_v50, %v1614_v59  ;;  %v3455_v51 = vmul.u32.u64.high %v1615_v50, %v1614_v59, %v3454_v30  ;;  %v3457_v61 = vmul.u32.u64.low %v1615_v50, %v1610_v2  ;;  %v3458_v48 = vmul.u32.u64.high %v1615_v50, %v1610_v2, %v3457_v61 }
 0x1d6   :  { %v1302_v56 = vshrl.u32 %v1284_v28, %v1300_v19  ;;  %v1305_v29 = vadd.s32 127, %v1304_v15  ;;  %vm1437_vm10 = vcmp.eq.s32.totalorder %v3408_v23, 0  ;;  %vm1440_vm12 = vcmp.eq.s32.totalorder %v3408_v23, 2 }
 0x1d7   :  { %v2045_v54 = vpop.eup %2044  ;;  %v1622_v33 = vmul.u32 %v1615_v50, %v1606_v21  ;;  %v1454_v47 = vand.u32 2147483647, %v3426_v41  ;;  %v1914_v63 = vadd.s32 4294967169, %v1458_v13  ;;  %v1317_v3 = vsel %vm3441_vm9, 0, %v1315_v62 }
 0x1d8   :  { %v2047_v25 = vpop.eup %2046  ;;  %v1441_v52 = vxor.u32 2147483648, %v2045_v54  ;;  %v1303_v4 = vor.u32 %v1302_v56, %v1301_v11  ;;  %v1306_v31 = vshll.u32 %v1305_v29, 23  ;;  %vm1624_vm15 = vc.u32 %v3455_v51, %v3457_v61 }
 0x1d9   :  { %v1438_v28 = vxor.u32 2147483648, %v2047_v25  ;;  %v1625_v37 = vadd.s32 1, %v3458_v48  ;;  %vm1433_vm1 = vweird.f32 %v3170_v16  ;;  %v1464_v57 = vadd.s32 1, %v1914_v63 }
 0x1da   :  { %v1442_v44 = vsel %vm1440_vm12, %v1441_v52, %v2047_v25  ;;  %v1307_v0 = vor.u32 4788187, %v1306_v31  ;;  %v1310_v38 = vcvt.s32.f32 %v1303_v4  ;;  %v1321_v6 = vadd.s32 3, %v1317_v3 }
 0x1db   :  { %v1439_v36 = vsel %vm1437_vm10, %v2045_v54, %v1438_v28  ;;  %v1626_v24 = vsel %vm1624_vm15, %v1625_v37, %v3458_v48  ;;  %v1461_v16 = vand.u32 8388607, %v1454_v47  ;;  %vm1465_vm2 = vcmp.gt.s32.totalorder %v1464_v57, 0 }
 0x1dc   :  { %v1443_v12 = vsel %vm1436_vm11, %v1439_v36, %v1442_v44  ;;  %v1308_v43 = vand.u32 2147483647, %v1307_v0  ;;  %v1627_v50 = vadd.s32 %v1626_v24, %v1622_v33  ;;  %v1676_v45 = vstv %s3461_s2 }
 0x1dd   :  { %v1444_v46 = vsel %vm1433_vm1, nan, %v1443_v12  ;;  %v1466_v39 = vsel %vm1465_vm2, %v1464_v57, 0  ;;  %v3488_v23 = vand.u32 3, %v1321_v6  ;;  %v1677_v34 = vmul.f32 %v3339_v17, %v1676_v45 }
 0x1de   :  { %v1445_v10 = vmul.f32 %v1444_v46, %v3047_v32  ;;  %v1311_v26 = vmul.f32 %v1310_v38, %v1308_v43  ;;  %v1628_v42 = vadd.s32 536870912, %v1627_v50  ;;  %v1468_v18 = vand.u32 31, %v1466_v39 }
 0x1df   :  { %v1462_v20 = vor.u32 8388608, %v1461_v16  ;;  %v1467_v8 = vshrl.u32 %v1466_v39, 5  ;;  %v1678_v27 = vstv %s3474_s10  ;;  %vm1324_vm14 = vcmp.eq.s32.totalorder %v3488_v23, 0 }
 0x1e0   :  { %1446 = vadd.xlane.f32.xlu0 %v1445_v10  ;;  %v1312_v14 = vxor.u32 2147483648, %v1311_v26  ;;  %v3490_v9 = vshrl.u32 %v1628_v42, 30  ;;  %v1469_v22 = vsub.s32 32, %v1468_v18  ;;  %v1471_v19 = vshll.u32 %v2149_v53, %v1468_v18 }
 0x1e1   :  { %v1474_v11 = vshll.u32 %v2150_v55, %v1468_v18  ;;  %v1477_v30 = vshll.u32 %v2151_v58, %v1468_v18  ;;  %v1480_v29 = vshll.u32 %v2148_v49, %v1468_v18  ;;  %v3510_v13 = vadd.f32 %v1678_v27, %v1677_v34 }
 0x1e2   :  { %v1313_v2 = vsel %vm1230_vm4, %v1312_v14, %v1311_v26  ;;  %v1630_v59 = vshll.u32 %v3490_v9, 30  ;;  %v1472_v21 = vshrl.u32 %v2150_v55, %v1469_v22  ;;  %v1475_v17 = vshrl.u32 %v2151_v58, %v1469_v22 }
 0x1e3   :  { %v1316_v15 = vsel %vm3441_vm9, %v3238_v40, %v1313_v2  ;;  %v1478_v56 = vshrl.u32 %v2148_v49, %v1469_v22  ;;  %v1470_v62 = vshrl.u32 %v2149_v53, %v1469_v22  ;;  %v1481_v25 = vshrl.u32 %v2152_v1, %v1469_v22 }
 0x1e4   :  { %2048 = vcosq.f32 %v1316_v15  ;;  %v3505_v48 = vsub.s32 %v1627_v50, %v1630_v59  ;;  %v1473_v54 = vor.u32 %v1472_v21, %v1471_v19  ;;  %v1476_v33 = vor.u32 %v1475_v17, %v1474_v11 }
 0x1e5   :  { %2050 = vsinq.f32 %v1316_v15  ;;  %v1479_v52 = vor.u32 %v1478_v56, %v1477_v30  ;;  %v1483_v4 = vshll.u32 %v2152_v1, %v1468_v18  ;;  %v1484_v31 = vshrl.u32 %v2153_v7, %v1469_v22 }
 0x1e6   :  { %v1633_v60 = vsub.s32 0, %v3505_v48  ;;  %vm1486_vm5 = vcmp.lt.s32.totalorder %v1467_v8, 1  ;;  %vm1323_vm3 = vcmp.lt.s32.totalorder %v3488_v23, 2  ;;  %vm1327_vm4 = vcmp.eq.s32.totalorder %v3488_v23, 2 }
 0x1e7   :  { %v1482_v28 = vor.u32 %v1481_v25, %v1480_v29  ;;  %v1502_v3 = vshll.u32 %v1462_v20, 8  ;;  %v1485_v37 = vor.u32 %v1484_v31, %v1483_v4  ;;  %vm1488_vm6 = vcmp.lt.s32.totalorder %v1467_v8, 3 }
 0x1e8   :  { %v1921_v63 = vmin.u32 %v1633_v60, %v3505_v48  ;;  %vm1489_vm7 = vcmp.lt.s32.totalorder %v1467_v8, 4  ;;  %v1683_v44 = vand.u32 2139095040, %v3510_v13  ;;  %vm1487_vm0 = vcmp.lt.s32.totalorder %v1467_v8, 2 }
 0x1e9   :  { %v1490_v38 = vsel %vm1486_vm5, %v1470_v62, %v1473_v54  ;;  %v1494_v36 = vsel %vm1486_vm5, %v1473_v54, %v1476_v33  ;;  %v1491_v24 = vsel %vm1489_vm7, %v1479_v52, 2102212464  ;;  %v1495_v57 = vsel %vm1489_vm7, %v1482_v28, 920167782 }
 0x1ea   :  { %v1635_v0 = vclz %v1921_v63  ;;  %v1498_v12 = vsel %vm1486_vm5, %v1476_v33, %v1479_v52  ;;  %v1499_v43 = vsel %vm1489_vm7, %v1485_v37, 1326507024  ;;  %v1492_v50 = vsel %vm1488_vm6, %v1476_v33, %v1491_v24 }
 0x1eb   :  { %v1496_v46 = vsel %vm1488_vm6, %v1479_v52, %v1495_v57  ;;  %v1500_v16 = vsel %vm1488_vm6, %v1482_v28, %v1499_v43  ;;  %v1623_v45 = vadd.s32 %v3457_v61, %v3455_v51  ;;  %v1684_v42 = vshrl.u32 %v1683_v44, 23 }
 0x1ec   :  { %v1922_v6 = vadd.s32 4294967294, %v1635_v0  ;;  %v1497_v10 = vsel %vm1487_vm0, %v1494_v36, %v1496_v46  ;;  %v1501_v26 = vsel %vm1487_vm0, %v1498_v12, %v1500_v16  ;;  %v1493_v18 = vsel %vm1487_vm0, %v1490_v38, %v1492_v50 }
 0x1ed   :  { %v3529_v14 = vmul.u32.u64.low %v1502_v3, %v1501_v26  ;;  %v3530_v34 = vmul.u32.u64.high %v1502_v3, %v1501_v26, %v3529_v14  ;;  %v3532_v2 = vmul.u32.u64.low %v1502_v3, %v1497_v10  ;;  %v3533_v59 = vmul.u32.u64.high %v1502_v3, %v1497_v10, %v3532_v2 }
 0x1ee   :  { %v2049_v39 = vpop.eup %2048  ;;  %vm1923_vm8 = vcmp.lt.s32.totalorder %v1922_v6, 0  ;;  %vm1320_vm9 = vweird.f32 %v3238_v40  ;;  %v1680_v15 = vand.u32 2147483647, %v3510_v13  ;;  %v1926_v21 = vadd.s32 4294967169, %v1684_v42 }
 0x1ef   :  { %v2051_v20 = vpop.eup %2050  ;;  %v1328_v22 = vxor.u32 2147483648, %v2049_v39  ;;  %v1638_v27 = vsel %vm1923_vm8, 0, %v1922_v6  ;;  %v1509_v29 = vmul.u32 %v1502_v3, %v1493_v18  ;;  %vm1511_vm13 = vc.u32 %v3530_v34, %v3532_v2 }
 0x1f0   :  { %v1325_v51 = vxor.u32 2147483648, %v2051_v20  ;;  %v1639_v61 = vsub.s32 32, %v1638_v27  ;;  %v1640_v19 = vshll.u32 %v3505_v48, %v1638_v27  ;;  %v1643_v11 = vsub.s32 4294967266, %v1638_v27 }
 0x1f1   :  { %v1329_v8 = vsel %vm1327_vm4, %v1328_v22, %v2051_v20  ;;  %v1512_v40 = vadd.s32 1, %v3533_v59  ;;  %v1690_v48 = vadd.s32 1, %v1926_v21  ;;  %v1653_v25 = vsub.s32 4, %v3490_v9 }
 0x1f2   :  { %v1326_v17 = vsel %vm1324_vm14, %v2049_v39, %v1325_v51  ;;  %v1641_v30 = vshrl.u32 %v1623_v45, %v1639_v61  ;;  %v1644_v56 = vadd.s32 127, %v1643_v11  ;;  %vm3553_vm10 = vcmp.le.f32.partialorder %v1567_v5, 0.7853982 }
 0x1f3   :  { %v1330_v62 = vsel %vm1323_vm3, %v1326_v17, %v1329_v8  ;;  %v1513_v4 = vsel %vm1511_vm13, %v1512_v40, %v3533_v59  ;;  %vm1691_vm11 = vcmp.gt.s32.totalorder %v1690_v48, 0  ;;  %vm1569_vm12 = vcmp.lt.s32.totalorder %v3354_v35, 0 }
 0x1f4   :  { %v1331_v60 = vsel %vm1320_vm9, nan, %v1330_v62  ;;  %v1642_v54 = vor.u32 %v1641_v30, %v1640_v19  ;;  %v1645_v33 = vshll.u32 %v1644_v56, 23  ;;  %v1514_v23 = vadd.s32 %v1513_v4, %v1509_v29 }
 0x1f5   :  { %v1332_v52 = vmul.f32 %v1331_v60, %v3047_v32  ;;  %v1692_v28 = vsel %vm1691_vm11, %v1690_v48, 0  ;;  %v1654_v0 = vsel %vm1569_vm12, %v1653_v25, %v3490_v9  ;;  %v1687_v36 = vand.u32 8388607, %v1680_v15 }
 0x1f6   :  { %v1646_v31 = vor.u32 4788187, %v1645_v33  ;;  %v1649_v63 = vcvt.s32.f32 %v1642_v54  ;;  %v1694_v37 = vand.u32 31, %v1692_v28  ;;  %v1515_v38 = vadd.s32 536870912, %v1514_v23 }
 0x1f7   :  { %1333 = vadd.xlane.f32.xlu1 %v1332_v52  ;;  %v1693_v24 = vshrl.u32 %v1692_v28, 5  ;;  %v1688_v39 = vor.u32 8388608, %v1687_v36  ;;  %v1656_v14 = vsel %vm3553_vm10, 0, %v1654_v0  ;;  %v1510_v3 = vadd.s32 %v3532_v2, %v3530_v34 }
 0x1f8   :  { %v1647_v44 = vand.u32 2147483647, %v1646_v31  ;;  %v1695_v57 = vsub.s32 32, %v1694_v37  ;;  %v1697_v12 = vshll.u32 %v2149_v53, %v1694_v37  ;;  %v1700_v5 = vshll.u32 %v2150_v55, %v1694_v37 }
 0x1f9   :  { %v3565_v6 = vshrl.u32 %v1515_v38, 30  ;;  %v1703_v50 = vshll.u32 %v2151_v58, %v1694_v37  ;;  %v1706_v46 = vshll.u32 %v2148_v49, %v1694_v37  ;;  %v1709_v10 = vshll.u32 %v2152_v1, %v1694_v37 }
 0x1fa   :  { %v1650_v43 = vmul.f32 %v1649_v63, %v1647_v44  ;;  %v1698_v16 = vshrl.u32 %v2150_v55, %v1695_v57  ;;  %v1701_v9 = vshrl.u32 %v2151_v58, %v1695_v57  ;;  %v1704_v45 = vshrl.u32 %v2148_v49, %v1695_v57 }
 0x1fb   :  { %v1517_v42 = vshll.u32 %v3565_v6, 30  ;;  %v1707_v18 = vshrl.u32 %v2152_v1, %v1695_v57  ;;  %v1696_v20 = vshrl.u32 %v2149_v53, %v1695_v57  ;;  %v1710_v55 = vshrl.u32 %v2153_v7, %v1695_v57 }
 0x1fc   :  { %v1651_v26 = vxor.u32 2147483648, %v1650_v43  ;;  %v1699_v22 = vor.u32 %v1698_v16, %v1697_v12  ;;  %v1702_v27 = vor.u32 %v1701_v9, %v1700_v5  ;;  %v1705_v59 = vor.u32 %v1704_v45, %v1703_v50 }
 0x1fd   :  { %v1518_v49 = vsub.s32 %v1514_v23, %v1517_v42  ;;  %v1708_v61 = vor.u32 %v1707_v18, %v1706_v46  ;;  %v1711_v1 = vor.u32 %v1710_v55, %v1709_v10  ;;  %vm1712_vm15 = vcmp.lt.s32.totalorder %v1693_v24, 1 }
 0x1fe   :  { %v1652_v58 = vsel %vm1569_vm12, %v1651_v26, %v1650_v43  ;;  %v1660_v19 = vadd.s32 3, %v1656_v14  ;;  %v1728_v53 = vshll.u32 %v1688_v39, 8  ;;  %vm1713_vm1 = vcmp.lt.s32.totalorder %v1693_v24, 2 }
 0x1ff   :  { %v1655_v51 = vsel %vm3553_vm10, %v3354_v35, %v1652_v58  ;;  %v1520_v11 = vsub.s32 0, %v1518_v49  ;;  %vm1714_vm2 = vcmp.lt.s32.totalorder %v1693_v24, 3  ;;  %vm1715_vm14 = vcmp.lt.s32.totalorder %v1693_v24, 4 }
 0x200   :  { %2052 = vcosq.f32 %v1655_v51  ;;  %v1716_v8 = vsel %vm1712_vm15, %v1696_v20, %v1699_v22  ;;  %v1717_v21 = vsel %vm1715_vm14, %v1705_v59, 2102212464  ;;  %v1720_v17 = vsel %vm1712_vm15, %v1699_v22, %v1702_v27 }
 0x201   :  { %2054 = vsinq.f32 %v1655_v51  ;;  %v1915_v7 = vmin.u32 %v1520_v11, %v1518_v49  ;;  %v1718_v30 = vsel %vm1714_vm2, %v1702_v27, %v1717_v21  ;;  %v1721_v56 = vsel %vm1715_vm14, %v1708_v61, 920167782 }
 0x202   :  { %v1724_v29 = vsel %vm1712_vm15, %v1702_v27, %v1705_v59  ;;  %v1725_v62 = vsel %vm1715_vm14, %v1711_v1, 1326507024  ;;  %v1661_v48 = vand.u32 3, %v1660_v19  ;;  %v1722_v60 = vsel %vm1714_vm2, %v1705_v59, %v1721_v56 }
 0x203   :  { %v1522_v40 = vclz %v1915_v7  ;;  %v1726_v54 = vsel %vm1714_vm2, %v1708_v61, %v1725_v62  ;;  %v1719_v25 = vsel %vm1713_vm1, %v1716_v8, %v1718_v30  ;;  %v1723_v52 = vsel %vm1713_vm1, %v1720_v17, %v1722_v60 }
 0x204   :  { %v1727_v4 = vsel %vm1713_vm1, %v1724_v29, %v1726_v54  ;;  %v3590_v23 = vmul.u32.u64.low %v1728_v53, %v1723_v52  ;;  %v3591_v28 = vmul.u32.u64.high %v1728_v53, %v1723_v52, %v3590_v23  ;;  %vm1666_vm3 = vcmp.eq.s32.totalorder %v1661_v48, 2 }
 0x205   :  { %v1916_v33 = vadd.s32 4294967294, %v1522_v40  ;;  %v3587_v31 = vmul.u32.u64.low %v1728_v53, %v1727_v4  ;;  %v3588_v63 = vmul.u32.u64.high %v1728_v53, %v1727_v4, %v3587_v31  ;;  %v1735_v57 = vmul.u32 %v1728_v53, %v1719_v25 }
 0x206   :  { %vm1663_vm4 = vcmp.eq.s32.totalorder %v1661_v48, 0  ;;  %v1738_v5 = vadd.s32 1, %v3591_v28  ;;  %vm1662_vm7 = vcmp.lt.s32.totalorder %v1661_v48, 2  ;;  %vm1659_vm0 = vweird.f32 %v3354_v35 }
 0x207   :  { %vm1917_vm5 = vcmp.lt.s32.totalorder %v1916_v33, 0  ;;  %vm1737_vm6 = vc.u32 %v3588_v63, %v3590_v23  ;;  %v1540_v55 = vsub.s32 4, %v3565_v6  ;;  %vm1456_vm8 = vcmp.lt.s32.totalorder %v3426_v41, 0 }
 0x208   :  { %v1525_v37 = vsel %vm1917_vm5, 0, %v1916_v33  ;;  %v1739_v2 = vsel %vm1737_vm6, %v1738_v5, %v3591_v28  ;;  %vm1455_vm9 = vcmp.le.f32.partialorder %v1454_v47, 0.7853982  ;;  %v1736_v30 = vadd.s32 %v3590_v23, %v3588_v63 }
 0x209   :  { %v1526_v0 = vsub.s32 32, %v1525_v37  ;;  %v1527_v38 = vshll.u32 %v1518_v49, %v1525_v37  ;;  %v1530_v36 = vsub.s32 4294967266, %v1525_v37  ;;  %v1740_v10 = vadd.s32 %v1739_v2, %v1735_v57 }
 0x20a   :  { %v2053_v44 = vpop.eup %2052  ;;  %v1541_v59 = vsel %vm1456_vm8, %v1540_v55, %v3565_v6  ;;  %vm1546_vm15 = vweird.f32 %v3426_v41  ;;  %vm1682_vm1 = vcmp.lt.s32.totalorder %v3510_v13, 0  ;;  %vm1681_vm2 = vcmp.le.f32.partialorder %v1680_v15, 0.7853982 }
 0x20b   :  { %v2055_v12 = vpop.eup %2054  ;;  %v1667_v24 = vxor.u32 2147483648, %v2053_v44  ;;  %v1528_v50 = vshrl.u32 %v1510_v3, %v1526_v0  ;;  %v1531_v46 = vadd.s32 127, %v1530_v36  ;;  %v1741_v14 = vadd.s32 536870912, %v1740_v10 }
 0x20c   :  { %v1664_v43 = vxor.u32 2147483648, %v2055_v12  ;;  %v1543_v11 = vsel %vm1455_vm9, 0, %v1541_v59  ;;  %vm1787_vm6 = vcmask 7168  }
 0x20d   :  { %v1668_v34 = vsel %vm1666_vm3, %v1667_v24, %v2055_v12  ;;  %v1529_v9 = vor.u32 %v1528_v50, %v1527_v38  ;;  %v1532_v45 = vshll.u32 %v1531_v46, 23  ;;  %v1742_v58 = vshrl.u32 %v1741_v14, 30 }
 0x20e   :  { %v1665_v16 = vsel %vm1663_vm4, %v2053_v44, %v1664_v43  ;;  %v1547_v7 = vadd.s32 3, %v1543_v11  ;;  %vm1772_vm4 = vweird.f32 %v3510_v13 }
 0x20f   :  { %v1669_v26 = vsel %vm1662_vm7, %v1665_v16, %v1668_v34  ;;  %v1533_v39 = vor.u32 4788187, %v1532_v45  ;;  %v1536_v18 = vcvt.s32.f32 %v1529_v9  ;;  %v1743_v49 = vshll.u32 %v1742_v58, 30 }
 0x210   :  { %v1670_v42 = vsel %vm1659_vm0, nan, %v1669_v26  ;;  %v1548_v17 = vand.u32 3, %v1547_v7  ;;  %v1766_v44 = vsub.s32 4, %v1742_v58  ;;  %v91_v26 = vpop.xlane.xlu1 %90  ;;  %vm1789_vm7 = vcmask 15360  }
 0x211   :  { %v1671_v20 = vmul.f32 %v1670_v42, %v3047_v32  ;;  %v1534_v22 = vand.u32 2147483647, %v1533_v39  ;;  %v1744_v51 = vsub.s32 %v1740_v10, %v1743_v49  ;;  %v80_v42 = vpop.xlane.xlu0 %79  ;;  %vm1791_vm0 = vcmask 23552  }
 0x212   :  { %vm1553_vm11 = vcmp.eq.s32.totalorder %v1548_v17, 2  ;;  %vm1550_vm10 = vcmp.eq.s32.totalorder %v1548_v17, 0  ;;  %vm1549_vm12 = vcmp.lt.s32.totalorder %v1548_v17, 2  ;;  %v1767_v57 = vsel %vm1682_vm1, %v1766_v44, %v1742_v58 }
 0x213   :  { %1672 = vadd.xlane.f32.xlu0 %v1671_v20  ;;  %v1537_v35 = vmul.f32 %v1536_v18, %v1534_v22  ;;  %v1746_v1 = vsub.s32 0, %v1744_v51  ;;  %v1769_v24 = vsel %vm1681_vm2, 0, %v1767_v57 }
 0x214   :  { %v1773_v5 = vadd.s32 3, %v1769_v24  ;;  %v317_v39 = vpop.xlane.xlu1 %316 }
 0x215   :  { %v1538_v27 = vxor.u32 2147483648, %v1537_v35  ;;  %v1927_v53 = vmin.u32 %v1746_v1, %v1744_v51  ;;  %v204_v18 = vpop.xlane.xlu0 %203 }
 0x216   :  { %v1774_v43 = vand.u32 3, %v1773_v5  ;;  %v1788_v55 = vsel %vm1787_vm6, %v91_v26, %v204_v18 }
 0x217   :  { %v1539_v61 = vsel %vm1456_vm8, %v1538_v27, %v1537_v35  ;;  %v1748_v8 = vclz %v1927_v53  ;;  %vm1793_vm8 = vcmask 31744  }
 0x218   :  { %v1542_v19 = vsel %vm1455_vm9, %v3426_v41, %v1539_v61  ;;  %vm1779_vm14 = vcmp.eq.s32.totalorder %v1774_v43, 2  ;;  %vm1776_vm5 = vcmp.eq.s32.totalorder %v1774_v43, 0  ;;  %vm1775_vm3 = vcmp.lt.s32.totalorder %v1774_v43, 2  ;;  %v430_v14 = vpop.xlane.xlu1 %429 }
 0x219   :  { %2056 = vcosq.f32 %v1542_v19  ;;  %v1928_v21 = vadd.s32 4294967294, %v1748_v8  ;;  %v543_v20 = vpop.xlane.xlu0 %542  ;;  %vm1795_vm9 = vcmask 39936  }
 0x21a   :  { %2058 = vsinq.f32 %v1542_v19  ;;  %v81_v19 = vadd.f32 1e-08, %v80_v42 }
 0x21b   :  { %vm1929_vm13 = vcmp.lt.s32.totalorder %v1928_v21, 0 }
 0x21c   :  { %v1751_v47 = vsel %vm1929_vm13, 0, %v1928_v21  ;;  %v656_v22 = vpop.xlane.xlu1 %655  ;;  %vm1797_vm13 = vcmask 48128  }
 0x21d   :  { %v1752_v56 = vsub.s32 32, %v1751_v47  ;;  %v1753_v29 = vshll.u32 %v1744_v51, %v1751_v47  ;;  %v1756_v6 = vsub.s32 4294967266, %v1751_v47  ;;  %v769_v58 = vpop.xlane.xlu0 %768 }
 0x21f   :  { %v1754_v40 = vshrl.u32 %v1736_v30, %v1752_v56  ;;  %v1757_v48 = vadd.s32 127, %v1756_v6 }
 0x221   :  { %v1755_v25 = vor.u32 %v1754_v40, %v1753_v29  ;;  %v1758_v52 = vshll.u32 %v1757_v48, 23  ;;  %v995_v59 = vpop.xlane.xlu0 %994 }
 0x223   :  { %v2057_v62 = vpop.eup %2056  ;;  %v1759_v63 = vor.u32 4788187, %v1758_v52  ;;  %v1762_v23 = vcvt.s32.f32 %v1755_v25  ;;  %v882_v35 = vpop.xlane.xlu1 %881 }
 0x224   :  { %v2059_v60 = vpop.eup %2058  ;;  %v1554_v54 = vxor.u32 2147483648, %v2057_v62 }
 0x225   :  { %v1551_v33 = vxor.u32 2147483648, %v2059_v60  ;;  %v1760_v37 = vand.u32 2147483647, %v1759_v63 }
 0x226   :  { %v1555_v4 = vsel %vm1553_vm11, %v1554_v54, %v2059_v60  ;;  %vm1799_vm11 = vcmask 56320  }
 0x227   :  { %v1552_v31 = vsel %vm1550_vm10, %v2057_v62, %v1551_v33  ;;  %v1763_v38 = vmul.f32 %v1762_v23, %v1760_v37  ;;  %vm1801_vm10 = vcmask 64512  }
 0x228   :  { %v1556_v28 = vsel %vm1549_vm12, %v1552_v31, %v1555_v4  ;;  %vm1803_vm12 = vcmask 72704  }
 0x229   :  { %v1557_v3 = vsel %vm1546_vm15, nan, %v1556_v28  ;;  %v1764_v36 = vxor.u32 2147483648, %v1763_v38  ;;  %vm1805_vm15 = vcmask 80896  }
 0x22a   :  { %v1558_v0 = vmul.f32 %v1557_v3, %v3047_v32 }
 0x22b   :  { %v1765_v41 = vsel %vm1682_vm1, %v1764_v36, %v1763_v38  ;;  %vm1807_vm1 = vcmask 89088  }
 0x22c   :  { %1559 = vadd.xlane.f32.xlu1 %v1558_v0  ;;  %v1768_v12 = vsel %vm1681_vm2, %v3510_v13, %v1765_v41  ;;  %v1790_v13 = vsel %vm1789_vm7, %v1788_v55, %v317_v39  ;;  %vm1809_vm2 = vcmask 97280  }
 0x22d   :  { %2060 = vcosq.f32 %v1768_v12  ;;  %v1792_v49 = vsel %vm1791_vm0, %v1790_v13, %v430_v14 }
 0x22e   :  { %2062 = vsinq.f32 %v1768_v12  ;;  %v1794_v27 = vsel %vm1793_vm8, %v1792_v49, %v543_v20 }
 0x22f   :  { %2064 = vrcp.f32 %v81_v19 }
 0x237   :  { %v2061_v50 = vpop.eup %2060 }
 0x238   :  { %v2063_v46 = vpop.eup %2062  ;;  %v1780_v34 = vxor.u32 2147483648, %v2061_v50 }
 0x239   :  { %v1777_v2 = vxor.u32 2147483648, %v2063_v46  ;;  %v1221_v11 = vpop.xlane.xlu0 %1220  ;;  %v2065_v48 = vpop.eup %2064 }
 0x23a   :  { %v1781_v15 = vsel %vm1779_vm14, %v1780_v34, %v2063_v46  ;;  %vm1811_vm14 = vcmask 105472  }
 0x23b   :  { %v1778_v16 = vsel %vm1776_vm5, %v2061_v50, %v1777_v2  ;;  %vm1813_vm5 = vcmask 113664  }
 0x23c   :  { %v1782_v9 = vsel %vm1775_vm3, %v1778_v16, %v1781_v15  ;;  %vm1815_vm3 = vcmask 121856  }
 0x23d   :  { %v1783_v45 = vsel %vm1772_vm4, nan, %v1782_v9  ;;  %vm1819_vm4 = vcmask 130048  }
 0x23e   :  { %v1784_v10 = vmul.f32 %v1783_v45, %v3047_v32  ;;  %v1796_v32 = vsel %vm1795_vm9, %v1794_v27, %v656_v22 }
 0x23f   :  { %v1798_v61 = vsel %vm1797_vm13, %v1796_v32, %v769_v58 }
 0x240   :  { %1785 = vadd.xlane.f32.xlu1 %v1784_v10  ;;  %v1800_v1 = vsel %vm1799_vm11, %v1798_v61, %v882_v35 }
 0x241   :  { %v1802_v53 = vsel %vm1801_vm10, %v1800_v1, %v995_v59 }
 0x254   :  { %v1108_v51 = vpop.xlane.xlu1 %1107 }
 0x255   :  { %v1804_v8 = vsel %vm1803_vm12, %v1802_v53, %v1108_v51 }
 0x256   :  { %v1806_v21 = vsel %vm1805_vm15, %v1804_v8, %v1221_v11 }
 0x26d   :  { %v1447_v17 = vpop.xlane.xlu0 %1446 }
 0x284   :  { %v1334_v7 = vpop.xlane.xlu1 %1333 }
 0x285   :  { %v1808_v30 = vsel %vm1807_vm1, %v1806_v21, %v1334_v7 }
 0x286   :  { %v1810_v56 = vsel %vm1809_vm2, %v1808_v30, %v1447_v17 }
 0x2a0   :  { %v1673_v6 = vpop.xlane.xlu0 %1672 }
 0x2b9   :  { %v1560_v47 = vpop.xlane.xlu1 %1559 }
 0x2ba   :  { %v1812_v29 = vsel %vm1811_vm14, %v1810_v56, %v1560_v47 }
 0x2bb   :  { %v1814_v62 = vsel %vm1813_vm5, %v1812_v29, %v1673_v6 }
 0x2cd   :  { %v1786_v40 = vpop.xlane.xlu1 %1785 }
 0x2ce   :  { %v1816_v60 = vsel %vm1815_vm3, %v1814_v62, %v1786_v40 }
 0x2cf   :  { %v1817_v54 = vmul.f32 %v2065_v48, %v1816_v60 }
 0x2d1   :  { %2066 = vtanh.f32 %v1817_v54 }
 0x2db   :  { %v2067_v33 = vpop.eup %2066 }
 0x2dc   :  { %1820 = vst.msk [vmem:[#allocation9] sm:$0xff] %vm1819_vm4, %v2067_v33 }
 0x2dd   :  { %2125 = shalt.err (!%p2122_p6)
}
 0x2de   :  { %s2126_s16 = scalar_lea.hbm %s3631_s3, 128 }
 0x2df   :  { %p2127_p7 = scmp.ne.s32.totalorder %s3631_s3, %s2126_s16  ;;  %p2130_p8 = scmp.lt.u32.totalorder %s2126_s16, %s3631_s3 }
 0x2e1   :  { %p2132_p9 = pnand %p2130_p8, %p2127_p7 }
 0x2e3   :  { %2135 = shalt.err (!%p2132_p9)
}
 0x2e4   :  { %1830 = dma.vmem_to_hbm [thread:$0]  %s1828_s12, 128, %s3631_s3, [#allocation4]  }
 0x2e5   :  { %2142 = dma.done.wait [#allocation4], 128  }
 0x2e6   :  { %2143 = vsyncadd [#allocation4], 4294967168 }
 0x2e7   :  { %1834 = vsyncpa [#allocation3], 1 }
 0x2e8   :  { %1835 = vsyncpa [#allocation4], 1 }
 0x2e9   :  { %1836 = vsyncpa [#allocation5], 1 }
 0x2ea   :  { %1837 = vsyncpa [#allocation6], 1 }

</bundles_post_ra>
